<compile_context>
chip_gen: v5e
topology: v5e:2x2
jax: 0.10.0
libtpu: 0.0.40
codegen_flags: <defaults>
</compile_context>

<pallas_src>
import jax
import jax.numpy as jnp
from jax.experimental import pallas as pl
from jax.experimental.pallas import tpu as pltpu


def _round_up(x, m):
    return ((x + m - 1) // m) * m


def _make_neumf_kernel(num_extra_layers, mf_dim, l0):
    """Kernel for a fixed (static) MLP depth.

    Fused layout of the first stage (lane-aligned when l0 % 128 == 0):
      wu = [w1u | wmu]  (D, l0 + mf_dim)      wi = [w1i | wmi]
      b0 row0 (user bias) = [0 .. 0 | bmu]    row1 (item bias) = [b1 | bmi]
    """

    def kernel(*refs):
        it = iter(refs)
        user_ref = next(it)          # (TB, D)              f32
        item_ref = next(it)          # (TB, D)              f32
        wu_ref = next(it)            # (D, l0 + mf_dim)     bf16
        wi_ref = next(it)            # (D, l0 + mf_dim)     bf16
        b0_ref = next(it)            # (2, l0 + mf_dim)     f32
        layer_refs = [next(it) for _ in range(2 * num_extra_layers)]
        wp_ref = next(it)            # (1, mf_dim + L_last) f32  [wp_mf | wp_mlp]
        bp_ref = next(it)            # (1, 1)               f32
        out_ref = next(it)           # (TB, 1)              f32

        # bf16 operands for the MXU; f32 accumulation and f32 elementwise.
        user = user_ref[...].astype(jnp.bfloat16)
        item = item_ref[...].astype(jnp.bfloat16)
        b0 = b0_ref[...]

        fu = jnp.dot(user, wu_ref[...],
                     preferred_element_type=jnp.float32) + b0[0:1, :]
        fi = jnp.dot(item, wi_ref[...],
                     preferred_element_type=jnp.float32) + b0[1:2, :]

        # GMF branch: Linear(user) * Linear(item)
        mf_vec = fu[:, l0:] * fi[:, l0:]                      # (TB, mf_dim)
        # MLP branch, first layer on concat([user, item]) (concat folded).
        h = jnp.maximum(fu[:, :l0] + fi[:, :l0], 0.0)         # (TB, l0)

        for l in range(num_extra_layers):
            w = layer_refs[2 * l][...]                        # bf16
            b = layer_refs[2 * l + 1][...]                    # f32
            h = jnp.dot(h.astype(jnp.bfloat16), w,
                        preferred_element_type=jnp.float32) + b
            h = jnp.maximum(h, 0.0)

        # Predict layer on concat([mf_vec, h]) (concat folded): lane
        # reductions (XLU) + sigmoid (EUP) stay in-kernel on purpose.
        wp = wp_ref[...]
        logit = (jnp.sum(mf_vec * wp[:, :mf_dim], axis=-1, keepdims=True)
                 + jnp.sum(h * wp[:, mf_dim:], axis=-1, keepdims=True)
                 + bp_ref[...])                               # (TB, 1)
        out_ref[...] = jax.nn.sigmoid(logit)

    return kernel


def pack_params(params, mf_dim, layers, matmul_dtype=jnp.bfloat16):
    """Build the fused / packed operand list fed to the kernel."""
    l0 = layers[0]
    wu = jnp.concatenate([params["w1u"], params["wmu"]], axis=1).astype(matmul_dtype)
    wi = jnp.concatenate([params["w1i"], params["wmi"]], axis=1).astype(matmul_dtype)
    b_user = jnp.concatenate([jnp.zeros((1, l0), jnp.float32), params["bmu"]], axis=1)
    b_item = jnp.concatenate([params["b1"], params["bmi"]], axis=1)
    b0 = jnp.concatenate([b_user, b_item], axis=0)            # (2, l0 + mf_dim)

    packed = [wu, wi, b0]
    for l in range(1, len(layers)):
        packed.append(params[f"w{l + 1}"].astype(matmul_dtype))
        packed.append(params[f"b{l + 1}"])
    wp = jnp.concatenate([params["wp_mf"], params["wp_mlp"]], axis=1)  # (1, mf+L_last)
    packed += [wp, params["bp"]]
    return packed


def neumf_forward(user_emb, item_emb, params, mf_dim, layers, *, block_b=1024):
    """NeuMF forward in one gridded Pallas call (batch-tiled, weights resident)."""
    B, D = user_emb.shape

    if B > block_b:
        TB = _round_up(block_b, 128)      # gridded: lane/sublane friendly tile
    else:
        TB = _round_up(B, 8)              # single step: block == full array
    B_pad = _round_up(B, TB)
    if B_pad != B:
        pad = ((0, B_pad - B), (0, 0))
        user_emb = jnp.pad(user_emb, pad)
        item_emb = jnp.pad(item_emb, pad)

    packed = pack_params(params, mf_dim, layers)
    kernel = _make_neumf_kernel(len(layers) - 1, mf_dim, layers[0])

    act_spec = pl.BlockSpec((TB, D), lambda i: (i, 0))

    def resident_spec(arr):
        nd = arr.ndim
        # Constant block index -> fetched once, stays VMEM-resident over the grid.
        return pl.BlockSpec(arr.shape, lambda i, _nd=nd: (0,) * _nd)

    grid_spec = pl.GridSpec(
        grid=(B_pad // TB,),
        in_specs=[act_spec, act_spec] + [resident_spec(a) for a in packed],
        out_specs=pl.BlockSpec((TB, 1), lambda i: (i, 0)),
    )

    out = pl.pallas_call(
        kernel,
        out_shape=jax.ShapeDtypeStruct((B_pad, 1), jnp.float32),
        grid_spec=grid_spec,
        compiler_params=pltpu.CompilerParams(
            dimension_semantics=("parallel",)),   # shards batch over v7x's 2 TCs
    )(user_emb, item_emb, *packed)
    return out[:B]


def init_params(key, input_dim, mf_dim, layers):
    """Deterministic f32 params (PyTorch-equivalent shapes, pre-transposed)."""
    def dense(k, fan_in, fan_out):
        kw, kb = jax.random.split(k)
        w = jax.random.normal(kw, (fan_in, fan_out), jnp.float32) * 0.05
        b = jax.random.normal(kb, (1, fan_out), jnp.float32) * 0.05
        return w, b

    keys = jax.random.split(key, 4 + len(layers))
    params = {}
    params["wmu"], params["bmu"] = dense(keys[0], input_dim, mf_dim)
    params["wmi"], params["bmi"] = dense(keys[1], input_dim, mf_dim)

    # First MLP layer: (2*input_dim -> layers[0]); split W along its input dim
    # into user / item halves (equivalent to concat([user, item]) @ W).
    w1, b1 = dense(keys[2], 2 * input_dim, layers[0])
    params["w1u"] = w1[:input_dim]
    params["w1i"] = w1[input_dim:]
    params["b1"] = b1

    for l in range(1, len(layers)):
        w, b = dense(keys[2 + l], layers[l - 1], layers[l])
        params[f"w{l + 1}"] = w
        params[f"b{l + 1}"] = b

    # Predict layer: (mf_dim + layers[-1]) -> 1, split along its input dim and
    # stored as row vectors (lane reduction instead of a degenerate N=1 matmul).
    wp, bp = dense(keys[2 + len(layers)], mf_dim + layers[-1], 1)
    params["wp_mf"] = wp[:mf_dim].T          # (1, mf_dim)
    params["wp_mlp"] = wp[mf_dim:].T         # (1, layers[-1])
    params["bp"] = bp                        # (1, 1)
    return params


def neumf_reference(user_emb, item_emb, params, layers):
    """Plain-JAX f32 reference mirroring the PyTorch module."""
    mf = (user_emb @ params["wmu"] + params["bmu"]) * \
         (item_emb @ params["wmi"] + params["bmi"])
    x = jnp.concatenate([user_emb, item_emb], axis=-1)
    w1 = jnp.concatenate([params["w1u"], params["w1i"]], axis=0)
    h = jnp.maximum(x @ w1 + params["b1"], 0.0)
    for l in range(1, len(layers)):
        h = jnp.maximum(h @ params[f"w{l + 1}"] + params[f"b{l + 1}"], 0.0)
    pv = jnp.concatenate([mf, h], axis=-1)
    wp = jnp.concatenate([params["wp_mf"], params["wp_mlp"]], axis=1)
    return jax.nn.sigmoid(pv @ wp.T + params["bp"])


if __name__ == "__main__":
    # input_dim=768 is fixed by the module (its first MLP layer expects 1536 =
    # 2*768 concat inputs); batch kept small for the demo.  Real deployments
    # should batch requests so the grid tile (default 1024 rows) is filled.
    B, INPUT_DIM, MF_DIM = 8, 768, 32
    LAYERS = [128, 64]

    key = jax.random.PRNGKey(0)
    k_params, k_user, k_item = jax.random.split(key, 3)
    params = init_params(k_params, INPUT_DIM, MF_DIM, LAYERS)
    user_emb = jax.random.normal(k_user, (B, INPUT_DIM), jnp.float32)
    item_emb = jax.random.normal(k_item, (B, INPUT_DIM), jnp.float32)

    out = neumf_forward(user_emb, item_emb, params, MF_DIM, LAYERS)
    out = jax.block_until_ready(out)

    ref = neumf_reference(user_emb, item_emb, params, LAYERS)
    assert out.shape == (B, 1)
    # bf16 matmul operands (f32 accumulate) vs. all-f32 reference -> loose tol.
    assert jnp.allclose(out, ref, atol=2e-2, rtol=2e-2), "mismatch vs reference"

    print("KERNEL_OK")
</pallas_src>

<mosaic_0001>
module attributes {stable_mosaic.version = 11 : i64} {
  func.func @kernel(%arg0: i32, %arg1: memref<8x768xf32, #tpu.memory_space<vmem>>, %arg2: memref<8x768xf32, #tpu.memory_space<vmem>>, %arg3: memref<768x160xbf16, #tpu.memory_space<vmem>>, %arg4: memref<768x160xbf16, #tpu.memory_space<vmem>>, %arg5: memref<2x160xf32, #tpu.memory_space<vmem>>, %arg6: memref<128x64xbf16, #tpu.memory_space<vmem>>, %arg7: memref<1x64xf32, #tpu.memory_space<vmem>>, %arg8: memref<1x96xf32, #tpu.memory_space<vmem>>, %arg9: memref<1x1xf32, #tpu.memory_space<vmem>>, %arg10: memref<8x1xf32, #tpu.memory_space<vmem>>) attributes {dimension_semantics = [#tpu.dimension_semantics<parallel>], iteration_bounds = array<i64: 1>, scalar_prefetch = 0 : i64, scratch_operands = 0 : i64, tpu.core_type = #tpu.core_type<tc>, window_params = [{transform_indices = @transform_0, window_bounds = array<i64: 8, 768>}, {transform_indices = @transform_1, window_bounds = array<i64: 8, 768>}, {pipeline_mode = #tpu.pipeline_mode<synchronous>, transform_indices = @transform_2, window_bounds = array<i64: 768, 160>}, {pipeline_mode = #tpu.pipeline_mode<synchronous>, transform_indices = @transform_3, window_bounds = array<i64: 768, 160>}, {pipeline_mode = #tpu.pipeline_mode<synchronous>, transform_indices = @transform_4, window_bounds = array<i64: 2, 160>}, {pipeline_mode = #tpu.pipeline_mode<synchronous>, transform_indices = @transform_5, window_bounds = array<i64: 128, 64>}, {pipeline_mode = #tpu.pipeline_mode<synchronous>, transform_indices = @transform_6, window_bounds = array<i64: 1, 64>}, {pipeline_mode = #tpu.pipeline_mode<synchronous>, transform_indices = @transform_7, window_bounds = array<i64: 1, 96>}, {pipeline_mode = #tpu.pipeline_mode<synchronous>, transform_indices = @transform_8, window_bounds = array<i64: 1, 1>}, {transform_indices = @transform_9, window_bounds = array<i64: 8, 1>}]} {
    %c0 = arith.constant 0 : index
    %c0_0 = arith.constant 0 : index
    %0 = vector.load %arg1[%c0, %c0_0] : memref<8x768xf32, #tpu.memory_space<vmem>>, vector<8x768xf32>
    %1 = arith.truncf %0 : vector<8x768xf32> to vector<8x768xbf16>
    %c0_1 = arith.constant 0 : index
    %c0_2 = arith.constant 0 : index
    %2 = vector.load %arg2[%c0_1, %c0_2] : memref<8x768xf32, #tpu.memory_space<vmem>>, vector<8x768xf32>
    %3 = arith.truncf %2 : vector<8x768xf32> to vector<8x768xbf16>
    %c0_3 = arith.constant 0 : index
    %c0_4 = arith.constant 0 : index
    %4 = vector.load %arg5[%c0_3, %c0_4] : memref<2x160xf32, #tpu.memory_space<vmem>>, vector<2x160xf32>
    %c0_5 = arith.constant 0 : index
    %c0_6 = arith.constant 0 : index
    %5 = vector.load %arg3[%c0_5, %c0_6] : memref<768x160xbf16, #tpu.memory_space<vmem>>, vector<768x160xbf16>
    %cst = arith.constant dense<0.000000e+00> : vector<8x160xf32>
    %6 = tpu.matmul %1, %5, %cst {dimension_numbers = #tpu.dot_dimension_numbers<[1], [0], [0], [1], [0, 0, 1, 1], [], []>} : vector<8x768xbf16>, vector<768x160xbf16>, vector<8x160xf32> -> vector<8x160xf32>
    %7 = vector.extract_strided_slice %4 {offsets = [0, 0], sizes = [1, 160], strides = [1, 1]} : vector<2x160xf32> to vector<1x160xf32>
    %8 = vector.broadcast %7 : vector<1x160xf32> to vector<8x160xf32>
    %9 = arith.addf %6, %8 : vector<8x160xf32>
    %c0_7 = arith.constant 0 : index
    %c0_8 = arith.constant 0 : index
    %10 = vector.load %arg4[%c0_7, %c0_8] : memref<768x160xbf16, #tpu.memory_space<vmem>>, vector<768x160xbf16>
    %cst_9 = arith.constant dense<0.000000e+00> : vector<8x160xf32>
    %11 = tpu.matmul %3, %10, %cst_9 {dimension_numbers = #tpu.dot_dimension_numbers<[1], [0], [0], [1], [0, 0, 1, 1], [], []>} : vector<8x768xbf16>, vector<768x160xbf16>, vector<8x160xf32> -> vector<8x160xf32>
    %12 = vector.extract_strided_slice %4 {offsets = [1, 0], sizes = [1, 160], strides = [1, 1]} : vector<2x160xf32> to vector<1x160xf32>
    %13 = vector.broadcast %12 : vector<1x160xf32> to vector<8x160xf32>
    %14 = arith.addf %11, %13 : vector<8x160xf32>
    %15 = vector.extract_strided_slice %9 {offsets = [0, 128], sizes = [8, 32], strides = [1, 1]} : vector<8x160xf32> to vector<8x32xf32>
    %16 = vector.extract_strided_slice %14 {offsets = [0, 128], sizes = [8, 32], strides = [1, 1]} : vector<8x160xf32> to vector<8x32xf32>
    %17 = arith.mulf %15, %16 : vector<8x32xf32>
    %18 = vector.extract_strided_slice %9 {offsets = [0, 0], sizes = [8, 128], strides = [1, 1]} : vector<8x160xf32> to vector<8x128xf32>
    %19 = vector.extract_strided_slice %14 {offsets = [0, 0], sizes = [8, 128], strides = [1, 1]} : vector<8x160xf32> to vector<8x128xf32>
    %20 = arith.addf %18, %19 : vector<8x128xf32>
    %cst_10 = arith.constant 0.000000e+00 : f32
    %21 = vector.broadcast %cst_10 : f32 to vector<8x128xf32>
    %22 = arith.maximumf %20, %21 : vector<8x128xf32>
    %c0_11 = arith.constant 0 : index
    %c0_12 = arith.constant 0 : index
    %23 = vector.load %arg6[%c0_11, %c0_12] : memref<128x64xbf16, #tpu.memory_space<vmem>>, vector<128x64xbf16>
    %c0_13 = arith.constant 0 : index
    %c0_14 = arith.constant 0 : index
    %24 = vector.load %arg7[%c0_13, %c0_14] : memref<1x64xf32, #tpu.memory_space<vmem>>, vector<1x64xf32>
    %25 = arith.truncf %22 : vector<8x128xf32> to vector<8x128xbf16>
    %cst_15 = arith.constant dense<0.000000e+00> : vector<8x64xf32>
    %26 = tpu.matmul %25, %23, %cst_15 {dimension_numbers = #tpu.dot_dimension_numbers<[1], [0], [0], [1], [0, 0, 1, 1], [], []>} : vector<8x128xbf16>, vector<128x64xbf16>, vector<8x64xf32> -> vector<8x64xf32>
    %27 = vector.broadcast %24 : vector<1x64xf32> to vector<8x64xf32>
    %28 = arith.addf %26, %27 : vector<8x64xf32>
    %cst_16 = arith.constant 0.000000e+00 : f32
    %29 = vector.broadcast %cst_16 : f32 to vector<8x64xf32>
    %30 = arith.maximumf %28, %29 : vector<8x64xf32>
    %c0_17 = arith.constant 0 : index
    %c0_18 = arith.constant 0 : index
    %31 = vector.load %arg8[%c0_17, %c0_18] : memref<1x96xf32, #tpu.memory_space<vmem>>, vector<1x96xf32>
    %32 = vector.extract_strided_slice %31 {offsets = [0, 0], sizes = [1, 32], strides = [1, 1]} : vector<1x96xf32> to vector<1x32xf32>
    %33 = vector.broadcast %32 : vector<1x32xf32> to vector<8x32xf32>
    %34 = arith.mulf %17, %33 : vector<8x32xf32>
    %cst_19 = arith.constant dense<0.000000e+00> : vector<8xf32>
    %35 = vector.multi_reduction <add>, %34, %cst_19 [1] : vector<8x32xf32> to vector<8xf32>
    %36 = vector.shape_cast %35 : vector<8xf32> to vector<8x1xf32>
    %37 = vector.extract_strided_slice %31 {offsets = [0, 32], sizes = [1, 64], strides = [1, 1]} : vector<1x96xf32> to vector<1x64xf32>
    %38 = vector.broadcast %37 : vector<1x64xf32> to vector<8x64xf32>
    %39 = arith.mulf %30, %38 : vector<8x64xf32>
    %cst_20 = arith.constant dense<0.000000e+00> : vector<8xf32>
    %40 = vector.multi_reduction <add>, %39, %cst_20 [1] : vector<8x64xf32> to vector<8xf32>
    %41 = vector.shape_cast %40 : vector<8xf32> to vector<8x1xf32>
    %42 = arith.addf %36, %41 : vector<8x1xf32>
    %c0_21 = arith.constant 0 : index
    %c0_22 = arith.constant 0 : index
    %43 = vector.load %arg9[%c0_21, %c0_22] : memref<1x1xf32, #tpu.memory_space<vmem>>, vector<1x1xf32>
    %44 = vector.broadcast %43 : vector<1x1xf32> to vector<8x1xf32>
    %45 = arith.addf %42, %44 : vector<8x1xf32>
    %46 = arith.negf %45 : vector<8x1xf32>
    %47 = math.exp %46 : vector<8x1xf32>
    %cst_23 = arith.constant 1.000000e+00 : f32
    %48 = vector.broadcast %cst_23 : f32 to vector<8x1xf32>
    %49 = arith.addf %48, %47 : vector<8x1xf32>
    %50 = arith.divf %48, %49 : vector<8x1xf32>
    %c0_24 = arith.constant 0 : index
    %c0_25 = arith.constant 0 : index
    %51 = vector.load %arg10[%c0_24, %c0_25] : memref<8x1xf32, #tpu.memory_space<vmem>>, vector<8x1xf32>
    tpu.vector_store %arg10[%c0_24, %c0_25], %50 {strides = array<i32>} : memref<8x1xf32, #tpu.memory_space<vmem>>, vector<8x1xf32>,
    return
  }
  func.func @transform_0(%arg0: i32) -> (i32, i32) {
    %c0_i32 = arith.constant 0 : i32
    %c0_i32_0 = arith.constant 0 : i32
    return %arg0, %c0_i32 : i32, i32
  }
  func.func @transform_1(%arg0: i32) -> (i32, i32) {
    %c0_i32 = arith.constant 0 : i32
    %c0_i32_0 = arith.constant 0 : i32
    return %arg0, %c0_i32 : i32, i32
  }
  func.func @transform_2(%arg0: i32) -> (i32, i32) {
    %c0_i32 = arith.constant 0 : i32
    %c0_i32_0 = arith.constant 0 : i32
    %c0_i32_1 = arith.constant 0 : i32
    return %c0_i32, %c0_i32_0 : i32, i32
  }
  func.func @transform_3(%arg0: i32) -> (i32, i32) {
    %c0_i32 = arith.constant 0 : i32
    %c0_i32_0 = arith.constant 0 : i32
    %c0_i32_1 = arith.constant 0 : i32
    return %c0_i32, %c0_i32_0 : i32, i32
  }
  func.func @transform_4(%arg0: i32) -> (i32, i32) {
    %c0_i32 = arith.constant 0 : i32
    %c0_i32_0 = arith.constant 0 : i32
    %c0_i32_1 = arith.constant 0 : i32
    return %c0_i32, %c0_i32_0 : i32, i32
  }
  func.func @transform_5(%arg0: i32) -> (i32, i32) {
    %c0_i32 = arith.constant 0 : i32
    %c0_i32_0 = arith.constant 0 : i32
    %c0_i32_1 = arith.constant 0 : i32
    return %c0_i32, %c0_i32_0 : i32, i32
  }
  func.func @transform_6(%arg0: i32) -> (i32, i32) {
    %c0_i32 = arith.constant 0 : i32
    %c0_i32_0 = arith.constant 0 : i32
    %c0_i32_1 = arith.constant 0 : i32
    return %c0_i32, %c0_i32_0 : i32, i32
  }
  func.func @transform_7(%arg0: i32) -> (i32, i32) {
    %c0_i32 = arith.constant 0 : i32
    %c0_i32_0 = arith.constant 0 : i32
    %c0_i32_1 = arith.constant 0 : i32
    return %c0_i32, %c0_i32_0 : i32, i32
  }
  func.func @transform_8(%arg0: i32) -> (i32, i32) {
    %c0_i32 = arith.constant 0 : i32
    %c0_i32_0 = arith.constant 0 : i32
    %c0_i32_1 = arith.constant 0 : i32
    return %c0_i32, %c0_i32_0 : i32, i32
  }
  func.func @transform_9(%arg0: i32) -> (i32, i32) {
    %c0_i32 = arith.constant 0 : i32
    %c0_i32_0 = arith.constant 0 : i32
    return %arg0, %c0_i32 : i32, i32
  }
}

</mosaic_0001>

<bundles_post_ra>
// kernel: tpu_custom_call.1
= control target key start
LH: loop header
LB: loop body
LE: loop exit
PB: predicated region body
PF: predicated region fallthrough
CT: control target
= control target key end

     0   :  { %s2679_s12 = smov 96   ;;  %vm1627_vm0 = vcmask 261120   ;;  %vm1635_vm1 = vcmask 523264   ;;  %vm1664_vm4 = vcmask 7168   ;;  %s4011_s2 = inlined_call_operand.vmem [shape: bf16[768,160], index: 2, kind: input, shape index: {}]   ;;  %s4012_s0 = inlined_call_operand.vmem [shape: f32[8,768], index: 0, kind: input, shape index: {}]   ;;  %s4013_s3 = inlined_call_operand.vmem [shape: bf16[768,160], index: 3, kind: input, shape index: {}]   ;;  %s4014_s1 = inlined_call_operand.vmem [shape: f32[8,768], index: 1, kind: input, shape index: {}]   ;;  %s4015_s7 = inlined_call_operand.vmem [shape: f32[1,96], index: 7, kind: input, shape index: {}]   ;;  %s4016_s4 = inlined_call_operand.vmem [shape: f32[2,160], index: 4, kind: input, shape index: {}]   ;;  %s4017_s6 = inlined_call_operand.vmem [shape: f32[1,64], index: 6, kind: input, shape index: {}]   ;;  %s4018_s5 = inlined_call_operand.vmem [shape: bf16[128,64], index: 5, kind: input, shape index: {}]   ;;  %s4019_s8 = inlined_call_operand.<no memory space> [shape: f32[1,1], index: 8, kind: input, shape index: {}]   ;;  %s4020_s9 = inlined_call_operand.vmem [shape: f32[8,1], index: 9, kind: output, shape index: {}]  }
   0x1   :  { %v1728_v0 = vld [vmem:[%s4011_s2 + $0x70] sm:$0xf]  ;;  %v2486_v1 = vld [vmem:[%s4011_s2 + $0x74] sm:$0xf0]  ;;  %v1720_v11 = vld [vmem:[%s4011_s2 + $0x60] sm:$0xf] }
   0x2   :  { %v1792_v2 = vld [vmem:[%s4011_s2 + $0xf0] sm:$0xf]  ;;  %v1729_v3 = vor.u32 %v2486_v1, %v1728_v0  ;;  %v2502_v4 = vld [vmem:[%s4011_s2 + $0xf4] sm:$0xf0]  ;;  %v2484_v13 = vld [vmem:[%s4011_s2 + $0x64] sm:$0xf0] }
   0x3   :  { %v1856_v5 = vld [vmem:[%s4011_s2 + $0x170] sm:$0xf]  ;;  %v2518_v6 = vld [vmem:[%s4011_s2 + $0x174] sm:$0xf0]  ;;  %v1793_v7 = vor.u32 %v2502_v4, %v1792_v2  ;;  %v1784_v14 = vld [vmem:[%s4011_s2 + $0xe0] sm:$0xf]  ;;  %v1721_v16 = vor.u32 %v2484_v13, %v1720_v11 }
   0x4   :  { %v1857_v8 = vor.u32 %v2518_v6, %v1856_v5  ;;  %v1920_v9 = vld [vmem:[%s4011_s2 + $0x1f0] sm:$0xf]  ;;  %v2534_v10 = vld [vmem:[%s4011_s2 + $0x1f4] sm:$0xf0]  ;;  %642 = vmatpush.bf16.msra.mxu0 %v1729_v3  ;;  %v2500_v15 = vld [vmem:[%s4011_s2 + $0xe4] sm:$0xf0] }
   0x5   :  { %v1921_v12 = vor.u32 %v2534_v10, %v1920_v9  ;;  %655 = vmatpush.bf16.msra.mxu1 %v1793_v7  ;;  %v1785_v17 = vor.u32 %v2500_v15, %v1784_v14  ;;  %v1848_v18 = vld [vmem:[%s4011_s2 + $0x160] sm:$0xf]  ;;  %v2516_v19 = vld [vmem:[%s4011_s2 + $0x164] sm:$0xf0]  ;;  %v1712_v23 = vld [vmem:[%s4011_s2 + $0x50] sm:$0xf] }
   0x6   :  { %668 = vmatpush.bf16.msra.mxu2 %v1857_v8  ;;  %v1912_v20 = vld [vmem:[%s4011_s2 + $0x1e0] sm:$0xf]  ;;  %v1849_v21 = vor.u32 %v2516_v19, %v1848_v18  ;;  %v2532_v22 = vld [vmem:[%s4011_s2 + $0x1e4] sm:$0xf0]  ;;  %v2482_v24 = vld [vmem:[%s4011_s2 + $0x54] sm:$0xf0] }
   0x7   :  { %681 = vmatpush.bf16.msra.mxu3 %v1921_v12  ;;  %v1913_v25 = vor.u32 %v2532_v22, %v1912_v20  ;;  %v1776_v26 = vld [vmem:[%s4011_s2 + $0xd0] sm:$0xf]  ;;  %v2498_v27 = vld [vmem:[%s4011_s2 + $0xd4] sm:$0xf0]  ;;  %v1713_v29 = vor.u32 %v2482_v24, %v1712_v23  ;;  %v1704_v35 = vld [vmem:[%s4011_s2 + $0x40] sm:$0xf] }
   0x8   :  { %v1840_v28 = vld [vmem:[%s4011_s2 + $0x150] sm:$0xf]  ;;  %643 = vmatpush.bf16.msra.mxu0 %v1721_v16  ;;  %v2514_v30 = vld [vmem:[%s4011_s2 + $0x154] sm:$0xf0]  ;;  %v1777_v33 = vor.u32 %v2498_v27, %v1776_v26  ;;  %v2480_v36 = vld [vmem:[%s4011_s2 + $0x44] sm:$0xf0] }
   0x9   :  { %v1904_v31 = vld [vmem:[%s4011_s2 + $0x1d0] sm:$0xf]  ;;  %v2530_v32 = vld [vmem:[%s4011_s2 + $0x1d4] sm:$0xf0]  ;;  %656 = vmatpush.bf16.msra.mxu1 %v1785_v17  ;;  %v1841_v34 = vor.u32 %v2514_v30, %v1840_v28  ;;  %v1768_v37 = vld [vmem:[%s4011_s2 + $0xc0] sm:$0xf]  ;;  %v1705_v44 = vor.u32 %v2480_v36, %v1704_v35 }
   0xa   :  { %669 = vmatpush.bf16.msra.mxu2 %v1849_v21  ;;  %v1905_v38 = vor.u32 %v2530_v32, %v1904_v31  ;;  %v2496_v39 = vld [vmem:[%s4011_s2 + $0xc4] sm:$0xf0]  ;;  %v1832_v40 = vld [vmem:[%s4011_s2 + $0x140] sm:$0xf]  ;;  %v1696_v47 = vld [vmem:[%s4011_s2 + $0x30] sm:$0xf] }
   0xb   :  { %682 = vmatpush.bf16.msra.mxu3 %v1913_v25  ;;  %v2512_v41 = vld [vmem:[%s4011_s2 + $0x144] sm:$0xf0]  ;;  %v1896_v42 = vld [vmem:[%s4011_s2 + $0x1c0] sm:$0xf]  ;;  %v1769_v45 = vor.u32 %v2496_v39, %v1768_v37  ;;  %v2478_v48 = vld [vmem:[%s4011_s2 + $0x34] sm:$0xf0] }
   0xc   :  { %v2528_v43 = vld [vmem:[%s4011_s2 + $0x1c4] sm:$0xf0]  ;;  %644 = vmatpush.bf16.msra.mxu0 %v1713_v29  ;;  %v1833_v46 = vor.u32 %v2512_v41, %v1832_v40  ;;  %v1760_v49 = vld [vmem:[%s4011_s2 + $0xb0] sm:$0xf]  ;;  %v2494_v51 = vld [vmem:[%s4011_s2 + $0xb4] sm:$0xf0]  ;;  %v1697_v56 = vor.u32 %v2478_v48, %v1696_v47 }
   0xd   :  { %657 = vmatpush.bf16.msra.mxu1 %v1777_v33  ;;  %v1897_v50 = vor.u32 %v2528_v43, %v1896_v42  ;;  %v1824_v52 = vld [vmem:[%s4011_s2 + $0x130] sm:$0xf]  ;;  %v2510_v53 = vld [vmem:[%s4011_s2 + $0x134] sm:$0xf0]  ;;  %v1761_v57 = vor.u32 %v2494_v51, %v1760_v49  ;;  %v1688_v59 = vld [vmem:[%s4011_s2 + $0x20] sm:$0xf] }
   0xe   :  { %670 = vmatpush.bf16.msra.mxu2 %v1841_v34  ;;  %v1888_v54 = vld [vmem:[%s4011_s2 + $0x1b0] sm:$0xf]  ;;  %v2526_v55 = vld [vmem:[%s4011_s2 + $0x1b4] sm:$0xf0]  ;;  %v1825_v58 = vor.u32 %v2510_v53, %v1824_v52  ;;  %v2476_v60 = vld [vmem:[%s4011_s2 + $0x24] sm:$0xf0] }
   0xf   :  { %683 = vmatpush.bf16.msra.mxu3 %v1905_v38  ;;  %v1752_v61 = vld [vmem:[%s4011_s2 + $0xa0] sm:$0xf]  ;;  %v1889_v62 = vor.u32 %v2526_v55, %v1888_v54  ;;  %v2492_v63 = vld [vmem:[%s4011_s2 + $0xa4] sm:$0xf0]  ;;  %v1689_v4 = vor.u32 %v2476_v60, %v1688_v59  ;;  %v1680_v7 = vld [vmem:[%s4011_s2 + $0x10] sm:$0xf] }
  0x10   :  { %645 = vmatpush.bf16.msra.mxu0 %v1705_v44  ;;  %v1816_v0 = vld [vmem:[%s4011_s2 + $0x120] sm:$0xf]  ;;  %v2508_v1 = vld [vmem:[%s4011_s2 + $0x124] sm:$0xf0]  ;;  %v1753_v5 = vor.u32 %v2492_v63, %v1752_v61  ;;  %v2474_v8 = vld [vmem:[%s4011_s2 + $0x14] sm:$0xf0] }
  0x11   :  { %658 = vmatpush.bf16.msra.mxu1 %v1769_v45  ;;  %v1880_v2 = vld [vmem:[%s4011_s2 + $0x1a0] sm:$0xf]  ;;  %v2524_v3 = vld [vmem:[%s4011_s2 + $0x1a4] sm:$0xf0]  ;;  %v1817_v6 = vor.u32 %v2508_v1, %v1816_v0  ;;  %v1744_v9 = vld [vmem:[%s4011_s2 + $0x90] sm:$0xf]  ;;  %v1681_v16 = vor.u32 %v2474_v8, %v1680_v7 }
  0x12   :  { %671 = vmatpush.bf16.msra.mxu2 %v1833_v46  ;;  %v1881_v10 = vor.u32 %v2524_v3, %v1880_v2  ;;  %v2490_v11 = vld [vmem:[%s4011_s2 + $0x94] sm:$0xf0]  ;;  %v1808_v12 = vld [vmem:[%s4011_s2 + $0x110] sm:$0xf]  ;;  %v1672_v17 = vld [vmem:[%s4011_s2] sm:$0xf] }
  0x13   :  { %684 = vmatpush.bf16.msra.mxu3 %v1897_v50  ;;  %v2506_v13 = vld [vmem:[%s4011_s2 + $0x114] sm:$0xf0]  ;;  %v1872_v14 = vld [vmem:[%s4011_s2 + $0x190] sm:$0xf]  ;;  %v2472_v18 = vld [vmem:[%s4011_s2 + $0x4] sm:$0xf0]  ;;  %v1745_v19 = vor.u32 %v2490_v11, %v1744_v9 }
  0x14   :  { %646 = vmatpush.bf16.msra.mxu0 %v1697_v56  ;;  %v2522_v15 = vld [vmem:[%s4011_s2 + $0x194] sm:$0xf0]  ;;  %v1809_v20 = vor.u32 %v2506_v13, %v1808_v12  ;;  %v1736_v21 = vld [vmem:[%s4011_s2 + $0x80] sm:$0xf]  ;;  %v2488_v22 = vld [vmem:[%s4011_s2 + $0x84] sm:$0xf0]  ;;  %v1673_v31 = vor.u32 %v2472_v18, %v1672_v17 }
  0x15   :  { %659 = vmatpush.bf16.msra.mxu1 %v1761_v57  ;;  %v1800_v23 = vld [vmem:[%s4011_s2 + $0x100] sm:$0xf]  ;;  %v1873_v24 = vor.u32 %v2522_v15, %v1872_v14  ;;  %v2504_v25 = vld [vmem:[%s4011_s2 + $0x104] sm:$0xf0]  ;;  %v1984_v26 = vld [vmem:[%s4011_s2 + $0x270] sm:$0xf]  ;;  %v1737_v35 = vor.u32 %v2488_v22, %v1736_v21 }
  0x16   :  { %672 = vmatpush.bf16.msra.mxu2 %v1825_v58  ;;  %v2550_v27 = vld [vmem:[%s4011_s2 + $0x274] sm:$0xf0]  ;;  %v2048_v28 = vld [vmem:[%s4011_s2 + $0x2f0] sm:$0xf]  ;;  %v2485_v30 = vld [vmem:[%s4011_s2 + $0x74] sm:$0xf]  ;;  %v1801_v36 = vor.u32 %v2504_v25, %v1800_v23 }
  0x17   :  { %685 = vmatpush.bf16.msra.mxu3 %v1889_v62  ;;  %v2566_v29 = vld [vmem:[%s4011_s2 + $0x2f4] sm:$0xf0]  ;;  %v1730_v32 = vld [vmem:[%s4011_s2 + $0x78] sm:$0xf0]  ;;  %v1864_v33 = vld [vmem:[%s4011_s2 + $0x180] sm:$0xf]  ;;  %v1985_v39 = vor.u32 %v2550_v27, %v1984_v26 }
  0x18   :  { %647 = vmatpush.bf16.msra.mxu0 %v1689_v4  ;;  %v2520_v34 = vld [vmem:[%s4011_s2 + $0x184] sm:$0xf0]  ;;  %v2501_v37 = vld [vmem:[%s4011_s2 + $0xf4] sm:$0xf]  ;;  %v1794_v38 = vld [vmem:[%s4011_s2 + $0xf8] sm:$0xf0]  ;;  %v2049_v40 = vor.u32 %v2566_v29, %v2048_v28  ;;  %v1733_v42 = vor.u32 %v2485_v30, %v1730_v32 }
  0x19   :  { %660 = vmatpush.bf16.msra.mxu1 %v1753_v5  ;;  %v1976_v41 = vld [vmem:[%s4011_s2 + $0x260] sm:$0xf]  ;;  %v1865_v43 = vor.u32 %v2520_v34, %v1864_v33  ;;  %v2548_v44 = vld [vmem:[%s4011_s2 + $0x264] sm:$0xf0]  ;;  %v1797_v47 = vor.u32 %v2501_v37, %v1794_v38  ;;  %v2483_v48 = vld [vmem:[%s4011_s2 + $0x64] sm:$0xf] }
  0x1a   :  { %673 = vmatpush.bf16.msra.mxu2 %v1817_v6  ;;  %v2040_v45 = vld [vmem:[%s4011_s2 + $0x2e0] sm:$0xf]  ;;  %v2564_v46 = vld [vmem:[%s4011_s2 + $0x2e4] sm:$0xf0]  ;;  %v1722_v49 = vld [vmem:[%s4011_s2 + $0x68] sm:$0xf0]  ;;  %v1977_v52 = vor.u32 %v2548_v44, %v1976_v41 }
  0x1b   :  { %686 = vmatpush.bf16.msra.mxu3 %v1881_v10  ;;  %v2499_v50 = vld [vmem:[%s4011_s2 + $0xe4] sm:$0xf]  ;;  %v1786_v51 = vld [vmem:[%s4011_s2 + $0xe8] sm:$0xf0]  ;;  %v2041_v53 = vor.u32 %v2564_v46, %v2040_v45  ;;  %v1968_v54 = vld [vmem:[%s4011_s2 + $0x250] sm:$0xf]  ;;  %v1725_v55 = vor.u32 %v2483_v48, %v1722_v49 }
  0x1c   :  { %648 = vmatpush.bf16.msra.mxu0 %v1681_v16  ;;  %v2546_v56 = vld [vmem:[%s4011_s2 + $0x254] sm:$0xf0]  ;;  %v2032_v57 = vld [vmem:[%s4011_s2 + $0x2d0] sm:$0xf]  ;;  %v1789_v59 = vor.u32 %v2499_v50, %v1786_v51  ;;  %v2481_v60 = vld [vmem:[%s4011_s2 + $0x54] sm:$0xf] }
  0x1d   :  { %661 = vmatpush.bf16.msra.mxu1 %v1745_v19  ;;  %v2562_v58 = vld [vmem:[%s4011_s2 + $0x2d4] sm:$0xf0]  ;;  %v1714_v61 = vld [vmem:[%s4011_s2 + $0x58] sm:$0xf0]  ;;  %v2497_v62 = vld [vmem:[%s4011_s2 + $0xd4] sm:$0xf]  ;;  %v1969_v1 = vor.u32 %v2546_v56, %v1968_v54 }
  0x1e   :  { %674 = vmatpush.bf16.msra.mxu2 %v1809_v20  ;;  %v1778_v63 = vld [vmem:[%s4011_s2 + $0xd8] sm:$0xf0]  ;;  %v34_v0 = vld [vmem:[%s4012_s0] sm:$0xff]  ;;  %v2033_v2 = vor.u32 %v2562_v58, %v2032_v57  ;;  %v35_v5 = vld [vmem:[%s4012_s0 + $0x8] sm:$0xff]  ;;  %v1717_v6 = vor.u32 %v2481_v60, %v1714_v61 }
  0x1f   :  { %687 = vmatpush.bf16.msra.mxu3 %v1873_v24  ;;  %v1960_v3 = vld [vmem:[%s4011_s2 + $0x240] sm:$0xf]  ;;  %v3000_v4 = vpack.c.bf16 %v34_v0, %v34_v0  ;;  %v2544_v7 = vld [vmem:[%s4011_s2 + $0x244] sm:$0xf0]  ;;  %v3014_v10 = vpack.c.bf16 %v35_v5, %v35_v5  ;;  %v1781_v11 = vor.u32 %v2497_v62, %v1778_v63  ;;  %v2479_v12 = vld [vmem:[%s4011_s2 + $0x44] sm:$0xf] }
  0x20   :  { %649 = vmatpush.bf16.msra.mxu0 %v1673_v31  ;;  %v2024_v8 = vld [vmem:[%s4011_s2 + $0x2c0] sm:$0xf]  ;;  %v2560_v9 = vld [vmem:[%s4011_s2 + $0x2c4] sm:$0xf0]  ;;  %v1706_v13 = vld [vmem:[%s4011_s2 + $0x48] sm:$0xf0]  ;;  %v1961_v17 = vor.u32 %v2544_v7, %v1960_v3 }
  0x21   :  { %662 = vmatpush.bf16.msra.mxu1 %v1737_v35  ;;  %v2495_v14 = vld [vmem:[%s4011_s2 + $0xc4] sm:$0xf]  ;;  %v1770_v15 = vld [vmem:[%s4011_s2 + $0xc8] sm:$0xf0]  ;;  %v36_v16 = vld [vmem:[%s4012_s0 + $0x10] sm:$0xff]  ;;  %v2025_v18 = vor.u32 %v2560_v9, %v2024_v8  ;;  %v1709_v21 = vor.u32 %v2479_v12, %v1706_v13 }
  0x22   :  { %675 = vmatpush.bf16.msra.mxu2 %v1801_v36  ;;  %v1952_v19 = vld [vmem:[%s4011_s2 + $0x230] sm:$0xf]  ;;  %v3036_v20 = vpack.c.bf16 %v36_v16, %v36_v16  ;;  %v2542_v22 = vld [vmem:[%s4011_s2 + $0x234] sm:$0xf0]  ;;  %v1773_v25 = vor.u32 %v2495_v14, %v1770_v15  ;;  %v2477_v26 = vld [vmem:[%s4011_s2 + $0x34] sm:$0xf] }
  0x23   :  { %688 = vmatpush.bf16.msra.mxu3 %v1865_v43  ;;  %650 = vmatmul.bf16.vlgmr.msra.gmra.mxu0 %v3000_v4  ;;  %v2016_v23 = vld [vmem:[%s4011_s2 + $0x2b0] sm:$0xf]  ;;  %v2558_v24 = vld [vmem:[%s4011_s2 + $0x2b4] sm:$0xf0]  ;;  %v1698_v27 = vld [vmem:[%s4011_s2 + $0x38] sm:$0xf0]  ;;  %v1953_v32 = vor.u32 %v2542_v22, %v1952_v19 }
  0x24   :  { %694 = vmatpush.bf16.msrb.mxu0 %v1985_v39  ;;  %663 = vmatmul.bf16.vlgmr.msra.gmra.mxu1 %v3014_v10  ;;  %v37_v28 = vld [vmem:[%s4012_s0 + $0x18] sm:$0xff]  ;;  %v2493_v29 = vld [vmem:[%s4011_s2 + $0xb4] sm:$0xf]  ;;  %v2017_v33 = vor.u32 %v2558_v24, %v2016_v23  ;;  %v1944_v34 = vld [vmem:[%s4011_s2 + $0x220] sm:$0xf]  ;;  %v1701_v35 = vor.u32 %v2477_v26, %v1698_v27 }
  0x25   :  { %707 = vmatpush.bf16.msrb.mxu1 %v2049_v40  ;;  %676 = vmatmul.bf16.vlgmr.msra.gmra.mxu2 %v3036_v20  ;;  %v1762_v30 = vld [vmem:[%s4011_s2 + $0xb8] sm:$0xf0]  ;;  %v3063_v31 = vpack.c.bf16 %v37_v28, %v37_v28  ;;  %v2540_v36 = vld [vmem:[%s4011_s2 + $0x224] sm:$0xf0]  ;;  %v2008_v37 = vld [vmem:[%s4011_s2 + $0x2a0] sm:$0xf] }
  0x26   :  { %720 = vmatpush.bf16.msrb.mxu2 %v1733_v42  ;;  %v2556_v38 = vld [vmem:[%s4011_s2 + $0x2a4] sm:$0xf0]  ;;  %v1765_v39 = vor.u32 %v2493_v29, %v1762_v30  ;;  %v2475_v40 = vld [vmem:[%s4011_s2 + $0x24] sm:$0xf]  ;;  %v1690_v41 = vld [vmem:[%s4011_s2 + $0x28] sm:$0xf0]  ;;  %v1945_v44 = vor.u32 %v2540_v36, %v1944_v34 }
  0x27   :  { %733 = vmatpush.bf16.msrb.mxu3 %v1797_v47  ;;  %v2491_v42 = vld [vmem:[%s4011_s2 + $0xa4] sm:$0xf]  ;;  %v1754_v43 = vld [vmem:[%s4011_s2 + $0xa8] sm:$0xf0]  ;;  %v2009_v45 = vor.u32 %v2556_v38, %v2008_v37  ;;  %v1936_v46 = vld [vmem:[%s4011_s2 + $0x210] sm:$0xf]  ;;  %v1693_v47 = vor.u32 %v2475_v40, %v1690_v41 }
  0x28   :  { %695 = vmatpush.bf16.msrb.mxu0 %v1977_v52  ;;  %689 = vmatmul.bf16.vlgmr.msra.gmra.mxu3 %v3063_v31  ;;  %v2538_v48 = vld [vmem:[%s4011_s2 + $0x214] sm:$0xf0]  ;;  %v2000_v49 = vld [vmem:[%s4011_s2 + $0x290] sm:$0xf]  ;;  %v1757_v51 = vor.u32 %v2491_v42, %v1754_v43  ;;  %v2473_v52 = vld [vmem:[%s4011_s2 + $0x14] sm:$0xf] }
  0x29   :  { %708 = vmatpush.bf16.msrb.mxu1 %v2041_v53  ;;  %v2554_v50 = vld [vmem:[%s4011_s2 + $0x294] sm:$0xf0]  ;;  %v1682_v53 = vld [vmem:[%s4011_s2 + $0x18] sm:$0xf0]  ;;  %v2489_v54 = vld [vmem:[%s4011_s2 + $0x94] sm:$0xf]  ;;  %v1937_v56 = vor.u32 %v2538_v48, %v1936_v46 }
  0x2a   :  { %721 = vmatpush.bf16.msrb.mxu2 %v1725_v55  ;;  %v1746_v55 = vld [vmem:[%s4011_s2 + $0x98] sm:$0xf0]  ;;  %v2001_v57 = vor.u32 %v2554_v50, %v2000_v49  ;;  %v1928_v58 = vld [vmem:[%s4011_s2 + $0x200] sm:$0xf]  ;;  %v1685_v61 = vor.u32 %v2473_v52, %v1682_v53  ;;  %v2552_v62 = vld [vmem:[%s4011_s2 + $0x284] sm:$0xf0] }
  0x2b   :  { %734 = vmatpush.bf16.msrb.mxu3 %v1789_v59  ;;  %v2536_v59 = vld [vmem:[%s4011_s2 + $0x204] sm:$0xf0]  ;;  %v1992_v60 = vld [vmem:[%s4011_s2 + $0x280] sm:$0xf]  ;;  %v2471_v63 = vld [vmem:[%s4011_s2 + $0x4] sm:$0xf] }
  0x2c   :  { %696 = vmatpush.bf16.msrb.mxu0 %v1969_v1  ;;  %v1674_v0 = vld [vmem:[%s4011_s2 + $0x8] sm:$0xf0]  ;;  %v1749_v1 = vor.u32 %v2489_v54, %v1746_v55  ;;  %v1858_v3 = vld [vmem:[%s4011_s2 + $0x178] sm:$0xf0]  ;;  %v2533_v5 = vld [vmem:[%s4011_s2 + $0x1f4] sm:$0xf]  ;;  %v1929_v9 = vor.u32 %v2536_v59, %v1928_v58 }
  0x2d   :  { %709 = vmatpush.bf16.msrb.mxu1 %v2033_v2  ;;  %v2517_v2 = vld [vmem:[%s4011_s2 + $0x174] sm:$0xf]  ;;  %v1986_v8 = vld [vmem:[%s4011_s2 + $0x278] sm:$0xf0]  ;;  %v2487_v12 = vld [vmem:[%s4011_s2 + $0x84] sm:$0xf]  ;;  %v1677_v15 = vor.u32 %v2471_v63, %v1674_v0 }
  0x2e   :  { %722 = vmatpush.bf16.msrb.mxu2 %v1717_v6  ;;  %v1922_v6 = vld [vmem:[%s4011_s2 + $0x1f8] sm:$0xf0]  ;;  %v2549_v7 = vld [vmem:[%s4011_s2 + $0x274] sm:$0xf]  ;;  %v1738_v13 = vld [vmem:[%s4011_s2 + $0x88] sm:$0xf0]  ;;  %v1861_v16 = vor.u32 %v2517_v2, %v1858_v3 }
  0x2f   :  { %735 = vmatpush.bf16.msrb.mxu3 %v1781_v11  ;;  %v1993_v11 = vor.u32 %v2552_v62, %v1992_v60  ;;  %v38_v14 = vld [vmem:[%s4012_s0 + $0x20] sm:$0xff]  ;;  %v39_v19 = vld [vmem:[%s4012_s0 + $0x28] sm:$0xff]  ;;  %v1989_v22 = vor.u32 %v2549_v7, %v1986_v8  ;;  %v1741_v26 = vor.u32 %v2487_v12, %v1738_v13  ;;  %v1842_v40 = vld [vmem:[%s4011_s2 + $0x158] sm:$0xf0] }
  0x30   :  { %697 = vmatpush.bf16.msrb.mxu0 %v1961_v17  ;;  %v2565_v17 = vld [vmem:[%s4011_s2 + $0x2f4] sm:$0xf]  ;;  %v2515_v23 = vld [vmem:[%s4011_s2 + $0x164] sm:$0xf]  ;;  %v1850_v24 = vld [vmem:[%s4011_s2 + $0x168] sm:$0xf0]  ;;  %v3186_v30 = vpack.c.bf16 %v38_v14, %v38_v14 }
  0x31   :  { %710 = vmatpush.bf16.msrb.mxu1 %v2025_v18  ;;  %v2050_v18 = vld [vmem:[%s4011_s2 + $0x2f8] sm:$0xf0]  ;;  %v1914_v27 = vld [vmem:[%s4011_s2 + $0x1e8] sm:$0xf0]  ;;  %v2547_v28 = vld [vmem:[%s4011_s2 + $0x264] sm:$0xf]  ;;  %v1853_v34 = vor.u32 %v2515_v23, %v1850_v24 }
  0x32   :  { %723 = vmatpush.bf16.msrb.mxu2 %v1709_v21  ;;  %v1925_v21 = vor.u32 %v2533_v5, %v1922_v6  ;;  %v1978_v29 = vld [vmem:[%s4011_s2 + $0x268] sm:$0xf0]  ;;  %v2529_v41 = vld [vmem:[%s4011_s2 + $0x1d4] sm:$0xf]  ;;  %v1906_v42 = vld [vmem:[%s4011_s2 + $0x1d8] sm:$0xf0] }
  0x33   :  { %736 = vmatpush.bf16.msrb.mxu3 %v1773_v25  ;;  %v2531_v25 = vld [vmem:[%s4011_s2 + $0x1e4] sm:$0xf]  ;;  %v2042_v36 = vld [vmem:[%s4011_s2 + $0x2e8] sm:$0xf0]  ;;  %v1981_v38 = vor.u32 %v2547_v28, %v1978_v29  ;;  %v2545_v43 = vld [vmem:[%s4011_s2 + $0x254] sm:$0xf]  ;;  %v1909_v49 = vor.u32 %v2529_v41, %v1906_v42 }
  0x34   :  { %698 = vmatpush.bf16.msrb.mxu0 %v1953_v32  ;;  %v2053_v32 = vor.u32 %v2565_v17, %v2050_v18  ;;  %v1917_v37 = vor.u32 %v2531_v25, %v1914_v27  ;;  %v2034_v48 = vld [vmem:[%s4011_s2 + $0x2d8] sm:$0xf0]  ;;  %v1834_v52 = vld [vmem:[%s4011_s2 + $0x148] sm:$0xf0]  ;;  %v2527_v53 = vld [vmem:[%s4011_s2 + $0x1c4] sm:$0xf] }
  0x35   :  { %711 = vmatpush.bf16.msrb.mxu1 %v2017_v33  ;;  %v3188_v33 = vpack.c.bf16 %v39_v19, %v39_v19  ;;  %v2543_v54 = vld [vmem:[%s4011_s2 + $0x244] sm:$0xf]  ;;  %v1962_v55 = vld [vmem:[%s4011_s2 + $0x248] sm:$0xf0]  ;;  %v1826_v62 = vld [vmem:[%s4011_s2 + $0x138] sm:$0xf0] }
  0x36   :  { %724 = vmatpush.bf16.msrb.mxu2 %v1701_v35  ;;  %v2563_v35 = vld [vmem:[%s4011_s2 + $0x2e4] sm:$0xf]  ;;  %v2026_v59 = vld [vmem:[%s4011_s2 + $0x2c8] sm:$0xf0]  ;;  %v2525_v63 = vld [vmem:[%s4011_s2 + $0x1b4] sm:$0xf] }
  0x37   :  { %737 = vmatpush.bf16.msrb.mxu3 %v1765_v39  ;;  %v2513_v39 = vld [vmem:[%s4011_s2 + $0x154] sm:$0xf]  ;;  %v2559_v58 = vld [vmem:[%s4011_s2 + $0x2c4] sm:$0xf]  ;;  %v1890_v0 = vld [vmem:[%s4011_s2 + $0x1b8] sm:$0xf0] }
  0x38   :  { %699 = vmatpush.bf16.msrb.mxu0 %v1945_v44  ;;  %v1970_v44 = vld [vmem:[%s4011_s2 + $0x258] sm:$0xf0]  ;;  %v1845_v46 = vor.u32 %v2513_v39, %v1842_v40  ;;  %v2029_v3 = vor.u32 %v2559_v58, %v2026_v59  ;;  %v2557_v6 = vld [vmem:[%s4011_s2 + $0x2b4] sm:$0xf]  ;;  %v1893_v8 = vor.u32 %v2525_v63, %v1890_v0  ;;  %v1818_v12 = vld [vmem:[%s4011_s2 + $0x128] sm:$0xf0] }
  0x39   :  { %712 = vmatpush.bf16.msrb.mxu1 %v2009_v45  ;;  %v2045_v45 = vor.u32 %v2563_v35, %v2042_v36  ;;  %v1973_v50 = vor.u32 %v2545_v43, %v1970_v44  ;;  %v1954_v2 = vld [vmem:[%s4011_s2 + $0x238] sm:$0xf0]  ;;  %v2523_v13 = vld [vmem:[%s4011_s2 + $0x1a4] sm:$0xf]  ;;  %v1882_v14 = vld [vmem:[%s4011_s2 + $0x1a8] sm:$0xf0] }
  0x3a   :  { %725 = vmatpush.bf16.msrb.mxu2 %v1693_v47  ;;  %v2561_v47 = vld [vmem:[%s4011_s2 + $0x2d4] sm:$0xf]  ;;  %v2018_v7 = vld [vmem:[%s4011_s2 + $0x2b8] sm:$0xf0]  ;;  %v2555_v19 = vld [vmem:[%s4011_s2 + $0x2a4] sm:$0xf] }
  0x3b   :  { %738 = vmatpush.bf16.msrb.mxu3 %v1757_v51  ;;  %v2511_v51 = vld [vmem:[%s4011_s2 + $0x144] sm:$0xf]  ;;  %v2021_v17 = vor.u32 %v2557_v6, %v2018_v7  ;;  %v2505_v24 = vld [vmem:[%s4011_s2 + $0x114] sm:$0xf]  ;;  %v1810_v25 = vld [vmem:[%s4011_s2 + $0x118] sm:$0xf0] }
  0x3c   :  { %700 = vmatpush.bf16.msrb.mxu0 %v1937_v56  ;;  %v2037_v56 = vor.u32 %v2561_v47, %v2034_v48  ;;  %v1874_v27 = vld [vmem:[%s4011_s2 + $0x198] sm:$0xf0]  ;;  %v2537_v28 = vld [vmem:[%s4011_s2 + $0x214] sm:$0xf]  ;;  %v1813_v35 = vor.u32 %v2505_v24, %v1810_v25  ;;  %v2519_v41 = vld [vmem:[%s4011_s2 + $0x184] sm:$0xf] }
  0x3d   :  { %713 = vmatpush.bf16.msrb.mxu1 %v2001_v57  ;;  %v1837_v57 = vor.u32 %v2511_v51, %v1834_v52  ;;  %v1938_v29 = vld [vmem:[%s4011_s2 + $0x218] sm:$0xf0]  ;;  %v1866_v42 = vld [vmem:[%s4011_s2 + $0x188] sm:$0xf0]  ;;  %v2535_v43 = vld [vmem:[%s4011_s2 + $0x204] sm:$0xf] }
  0x3e   :  { %726 = vmatpush.bf16.msrb.mxu2 %v1685_v61  ;;  %v1965_v61 = vor.u32 %v2543_v54, %v1962_v55  ;;  %v2002_v36 = vld [vmem:[%s4011_s2 + $0x298] sm:$0xf0]  ;;  %v1941_v40 = vor.u32 %v2537_v28, %v1938_v29  ;;  %v1930_v44 = vld [vmem:[%s4011_s2 + $0x208] sm:$0xf0]  ;;  %v2176_v48 = vld [vmem:[%s4013_s3 + $0xf0] sm:$0xf]  ;;  %v1869_v54 = vor.u32 %v2519_v41, %v1866_v42 }
  0x3f   :  { %739 = vmatpush.bf16.msrb.mxu3 %v1749_v1  ;;  %v2541_v1 = vld [vmem:[%s4011_s2 + $0x234] sm:$0xf]  ;;  %v2614_v52 = vld [vmem:[%s4013_s3 + $0x174] sm:$0xf0]  ;;  %v1933_v55 = vor.u32 %v2535_v43, %v1930_v44  ;;  %v2168_v63 = vld [vmem:[%s4013_s3 + $0xe0] sm:$0xf] }
  0x40   :  { %701 = vmatpush.bf16.msrb.mxu0 %v1929_v9  ;;  %v1957_v9 = vor.u32 %v2541_v1, %v1954_v2  ;;  %v2596_v0 = vld [vmem:[%s4013_s3 + $0xe4] sm:$0xf0]  ;;  %v2232_v2 = vld [vmem:[%s4013_s3 + $0x160] sm:$0xf]  ;;  %v2606_v41 = vld [vmem:[%s4013_s3 + $0x134] sm:$0xf0] }
  0x41   :  { %714 = vmatpush.bf16.msrb.mxu1 %v1993_v11  ;;  %v2507_v11 = vld [vmem:[%s4011_s2 + $0x124] sm:$0xf]  ;;  %v2628_v6 = vld [vmem:[%s4013_s3 + $0x1e4] sm:$0xf0]  ;;  %v2280_v28 = vld [vmem:[%s4013_s3 + $0x1c0] sm:$0xf] }
  0x42   :  { %727 = vmatpush.bf16.msrb.mxu2 %v1677_v15  ;;  %v2539_v15 = vld [vmem:[%s4011_s2 + $0x224] sm:$0xf]  ;;  %v1821_v18 = vor.u32 %v2507_v11, %v1818_v12  ;;  %v2578_v12 = vld [vmem:[%s4013_s3 + $0x54] sm:$0xf0]  ;;  %v2576_v24 = vld [vmem:[%s4013_s3 + $0x44] sm:$0xf0] }
  0x43   :  { %740 = vmatpush.bf16.msrb.mxu3 %v1741_v26  ;;  %702 = vmatmul.bf16.vlgmr.msrb.gmra.mxu0 %v3186_v30  ;;  %v2521_v26 = vld [vmem:[%s4011_s2 + $0x194] sm:$0xf]  ;;  %v2624_v29 = vld [vmem:[%s4013_s3 + $0x1c4] sm:$0xf0]  ;;  %v2272_v42 = vld [vmem:[%s4013_s3 + $0x1b0] sm:$0xf] }
  0x44   :  { %746 = vmatpush.bf16.msra.mxu0 %v1861_v16  ;;  %715 = vmatmul.bf16.vlgmr.msrb.gmra.mxu1 %v3188_v33  ;;  %v1946_v16 = vld [vmem:[%s4011_s2 + $0x228] sm:$0xf0]  ;;  %v1877_v39 = vor.u32 %v2521_v26, %v1874_v27  ;;  %v2216_v26 = vld [vmem:[%s4013_s3 + $0x140] sm:$0xf]  ;;  %v2608_v27 = vld [vmem:[%s4013_s3 + $0x144] sm:$0xf0] }
  0x45   :  { %759 = vmatpush.bf16.msra.mxu1 %v1925_v21  ;;  %728 = vmatmul.bf16.vlgmr.msrb.gmra.mxu2 %v3000_v4  ;;  %v1898_v4 = vld [vmem:[%s4011_s2 + $0x1c8] sm:$0xf0]  ;;  %v1949_v23 = vor.u32 %v2539_v15, %v1946_v16  ;;  %v2224_v16 = vld [vmem:[%s4013_s3 + $0x150] sm:$0xf]  ;;  %v2622_v43 = vld [vmem:[%s4013_s3 + $0x1b4] sm:$0xf0] }
  0x46   :  { %772 = vmatpush.bf16.msra.mxu2 %v1989_v22  ;;  %741 = vmatmul.bf16.vlgmr.msrb.gmra.mxu3 %v3014_v10  ;;  %v1901_v60 = vor.u32 %v2527_v53, %v1898_v4  ;;  %v2509_v10 = vld [vmem:[%s4011_s2 + $0x134] sm:$0xf]  ;;  %v2010_v21 = vld [vmem:[%s4011_s2 + $0x2a8] sm:$0xf0]  ;;  %v1885_v22 = vor.u32 %v2523_v13, %v1882_v14  ;;  %v2551_v53 = vld [vmem:[%s4011_s2 + $0x284] sm:$0xf] }
  0x47   :  { %785 = vmatpush.bf16.msra.mxu3 %v2053_v32  ;;  %v1829_v5 = vor.u32 %v2509_v10, %v1826_v62  ;;  %v2013_v32 = vor.u32 %v2555_v19, %v2010_v21  ;;  %v1994_v4 = vld [vmem:[%s4011_s2 + $0x288] sm:$0xf0]  ;;  %v2580_v62 = vld [vmem:[%s4013_s3 + $0x64] sm:$0xf0]  ;;  %v2160_v13 = vld [vmem:[%s4013_s3 + $0xd0] sm:$0xf] }
  0x48   :  { %747 = vmatpush.bf16.msra.mxu0 %v1853_v34  ;;  %v2553_v34 = vld [vmem:[%s4011_s2 + $0x294] sm:$0xf]  ;;  %v1997_v10 = vor.u32 %v2551_v53, %v1994_v4  ;;  %v2594_v14 = vld [vmem:[%s4013_s3 + $0xd4] sm:$0xf0]  ;;  %v2604_v53 = vld [vmem:[%s4013_s3 + $0x124] sm:$0xf0] }
  0x49   :  { %760 = vmatpush.bf16.msra.mxu1 %v1917_v37  ;;  %v2503_v37 = vld [vmem:[%s4011_s2 + $0x104] sm:$0xf]  ;;  %v2005_v47 = vor.u32 %v2553_v34, %v2002_v36  ;;  %v2626_v19 = vld [vmem:[%s4013_s3 + $0x1d4] sm:$0xf0]  ;;  %v2080_v34 = vld [vmem:[%s4013_s3 + $0x30] sm:$0xf] }
  0x4a   :  { %773 = vmatpush.bf16.msra.mxu2 %v1981_v38  ;;  %v1802_v38 = vld [vmem:[%s4011_s2 + $0x108] sm:$0xf0]  ;;  %v2574_v36 = vld [vmem:[%s4013_s3 + $0x34] sm:$0xf0]  ;;  %v2264_v4 = vld [vmem:[%s4013_s3 + $0x1a0] sm:$0xf] }
  0x4b   :  { %786 = vmatpush.bf16.msra.mxu3 %v2045_v45  ;;  %v2112_v45 = vld [vmem:[%s4013_s3 + $0x70] sm:$0xf]  ;;  %v1805_v51 = vor.u32 %v2503_v37, %v1802_v38  ;;  %v2590_v38 = vld [vmem:[%s4013_s3 + $0xb4] sm:$0xf0]  ;;  %v2081_v44 = vor.u32 %v2574_v36, %v2080_v34  ;;  %v2424_v34 = vld [vmem:[%s4013_s3 + $0x2e0] sm:$0xf] }
  0x4c   :  { %748 = vmatpush.bf16.msra.mxu0 %v1845_v46  ;;  %v2582_v46 = vld [vmem:[%s4013_s3 + $0x74] sm:$0xf0]  ;;  %v2144_v37 = vld [vmem:[%s4013_s3 + $0xb0] sm:$0xf] }
  0x4d   :  { %761 = vmatpush.bf16.msra.mxu1 %v1909_v49  ;;  %v2598_v49 = vld [vmem:[%s4013_s3 + $0xf4] sm:$0xf0]  ;;  %v2113_v58 = vor.u32 %v2582_v46, %v2112_v45  ;;  %v2145_v45 = vor.u32 %v2590_v38, %v2144_v37  ;;  %v2072_v46 = vld [vmem:[%s4013_s3 + $0x20] sm:$0xf]  ;;  %v2660_v37 = vld [vmem:[%s4013_s3 + $0x2e4] sm:$0xf0] }
  0x4e   :  { %774 = vmatpush.bf16.msra.mxu2 %v1973_v50  ;;  %v2240_v50 = vld [vmem:[%s4013_s3 + $0x170] sm:$0xf]  ;;  %v2177_v59 = vor.u32 %v2598_v49, %v2176_v48  ;;  %v2572_v48 = vld [vmem:[%s4013_s3 + $0x24] sm:$0xf0]  ;;  %v2136_v49 = vld [vmem:[%s4013_s3 + $0xa0] sm:$0xf] }
  0x4f   :  { %787 = vmatpush.bf16.msra.mxu3 %v2037_v56  ;;  %v2304_v56 = vld [vmem:[%s4013_s3 + $0x1f0] sm:$0xf]  ;;  %v2579_v38 = vld [vmem:[%s4013_s3 + $0x64] sm:$0xf] }
  0x50   :  { %749 = vmatpush.bf16.msra.mxu0 %v1837_v57  ;;  %v2630_v57 = vld [vmem:[%s4013_s3 + $0x1f4] sm:$0xf0] }
  0x51   :  { %762 = vmatpush.bf16.msra.mxu1 %v1901_v60  ;;  %v2104_v60 = vld [vmem:[%s4013_s3 + $0x60] sm:$0xf]  ;;  %v2305_v1 = vor.u32 %v2630_v57, %v2304_v56  ;;  %v2064_v57 = vld [vmem:[%s4013_s3 + $0x10] sm:$0xf] }
  0x52   :  { %775 = vmatpush.bf16.msra.mxu2 %v1965_v61  ;;  %v2241_v61 = vor.u32 %v2614_v52, %v2240_v50  ;;  %v2105_v7 = vor.u32 %v2580_v62, %v2104_v60  ;;  %v2588_v50 = vld [vmem:[%s4013_s3 + $0xa4] sm:$0xf0]  ;;  %v2200_v52 = vld [vmem:[%s4013_s3 + $0x120] sm:$0xf]  ;;  %v2128_v60 = vld [vmem:[%s4013_s3 + $0x90] sm:$0xf] }
  0x53   :  { %788 = vmatpush.bf16.msra.mxu3 %v2029_v3  ;;  %v2612_v3 = vld [vmem:[%s4013_s3 + $0x164] sm:$0xf0]  ;;  %v2137_v56 = vor.u32 %v2588_v50, %v2136_v49  ;;  %v2192_v62 = vld [vmem:[%s4013_s3 + $0x110] sm:$0xf] }
  0x54   :  { %750 = vmatpush.bf16.msra.mxu0 %v1829_v5  ;;  %v2296_v5 = vld [vmem:[%s4013_s3 + $0x1e0] sm:$0xf]  ;;  %v2233_v11 = vor.u32 %v2612_v3, %v2232_v2  ;;  %v2352_v50 = vld [vmem:[%s4013_s3 + $0x250] sm:$0xf] }
  0x55   :  { %763 = vmatpush.bf16.msra.mxu1 %v1893_v8  ;;  %v2169_v8 = vor.u32 %v2596_v0, %v2168_v63  ;;  %v2297_v15 = vor.u32 %v2628_v6, %v2296_v5  ;;  %v2602_v63 = vld [vmem:[%s4013_s3 + $0x114] sm:$0xf0]  ;;  %v2256_v0 = vld [vmem:[%s4013_s3 + $0x190] sm:$0xf]  ;;  %v2056_v2 = vld [vmem:[%s4013_s3] sm:$0xf] }
  0x56   :  { %776 = vmatpush.bf16.msra.mxu2 %v1957_v9  ;;  %v2096_v9 = vld [vmem:[%s4013_s3 + $0x50] sm:$0xf]  ;;  %v2568_v6 = vld [vmem:[%s4013_s3 + $0x4] sm:$0xf0] }
  0x57   :  { %789 = vmatpush.bf16.msra.mxu3 %v2021_v17  ;;  %v2610_v17 = vld [vmem:[%s4013_s3 + $0x154] sm:$0xf0]  ;;  %v2097_v21 = vor.u32 %v2578_v12, %v2096_v9  ;;  %v2193_v9 = vor.u32 %v2602_v63, %v2192_v62  ;;  %v2600_v12 = vld [vmem:[%s4013_s3 + $0x104] sm:$0xf0]  ;;  %v2408_v63 = vld [vmem:[%s4013_s3 + $0x2c0] sm:$0xf] }
  0x58   :  { %751 = vmatpush.bf16.msra.mxu0 %v1821_v18  ;;  %v2288_v18 = vld [vmem:[%s4013_s3 + $0x1d0] sm:$0xf]  ;;  %v2640_v62 = vld [vmem:[%s4013_s3 + $0x244] sm:$0xf0] }
  0x59   :  { %764 = vmatpush.bf16.msra.mxu1 %v1885_v22  ;;  %v2161_v22 = vor.u32 %v2594_v14, %v2160_v13  ;;  %v2289_v25 = vor.u32 %v2626_v19, %v2288_v18  ;;  %v2368_v13 = vld [vmem:[%s4013_s3 + $0x270] sm:$0xf]  ;;  %v2581_v18 = vld [vmem:[%s4013_s3 + $0x74] sm:$0xf]  ;;  %v2114_v19 = vld [vmem:[%s4013_s3 + $0x78] sm:$0xf0] }
  0x5a   :  { %777 = vmatpush.bf16.msra.mxu2 %v1949_v23  ;;  %v2225_v23 = vor.u32 %v2610_v17, %v2224_v16  ;;  %v2432_v16 = vld [vmem:[%s4013_s3 + $0x2f0] sm:$0xf]  ;;  %v2662_v17 = vld [vmem:[%s4013_s3 + $0x2f4] sm:$0xf0] }
  0x5b   :  { %790 = vmatpush.bf16.msra.mxu3 %v2013_v32 }
  0x5c   :  { %752 = vmatpush.bf16.msra.mxu0 %v1813_v35  ;;  %v2217_v35 = vor.u32 %v2608_v27, %v2216_v26  ;;  %v2178_v26 = vld [vmem:[%s4013_s3 + $0xf8] sm:$0xf0]  ;;  %v2360_v27 = vld [vmem:[%s4013_s3 + $0x260] sm:$0xf] }
  0x5d   :  { %765 = vmatpush.bf16.msra.mxu1 %v1877_v39  ;;  %v2281_v39 = vor.u32 %v2624_v29, %v2280_v28  ;;  %v47_v28 = vld [vmem:[%s4014_s1 + $0x8] sm:$0xff]  ;;  %v2433_v29 = vor.u32 %v2662_v17, %v2432_v16  ;;  %v2082_v16 = vld [vmem:[%s4013_s3 + $0x38] sm:$0xf0] }
  0x5e   :  { %778 = vmatpush.bf16.msra.mxu2 %v1941_v40  ;;  %v2208_v40 = vld [vmem:[%s4013_s3 + $0x130] sm:$0xf] }
  0x5f   :  { %791 = vmatpush.bf16.msra.mxu3 %v2005_v47  ;;  %v2209_v47 = vor.u32 %v2606_v41, %v2208_v40 }
  0x60   :  { %753 = vmatpush.bf16.msra.mxu0 %v1805_v51  ;;  %v2273_v51 = vor.u32 %v2622_v43, %v2272_v42  ;;  %v3593_v42 = vpack.c.bf16 %v47_v28, %v47_v28  ;;  %v49_v43 = vld [vmem:[%s4014_s1 + $0x18] sm:$0xff] }
  0x61   :  { %766 = vmatpush.bf16.msra.mxu1 %v1869_v54  ;;  %v2620_v54 = vld [vmem:[%s4013_s3 + $0x1a4] sm:$0xf0] }
  0x62   :  { %779 = vmatpush.bf16.msra.mxu2 %v1933_v55  ;;  %v2073_v55 = vor.u32 %v2572_v48, %v2072_v46  ;;  %v2170_v46 = vld [vmem:[%s4013_s3 + $0xe8] sm:$0xf0]  ;;  %v2425_v48 = vor.u32 %v2660_v37, %v2424_v34  ;;  %v2384_v37 = vld [vmem:[%s4013_s3 + $0x290] sm:$0xf] }
  0x63   :  { %792 = vmatpush.bf16.msra.mxu3 %v1997_v10  ;;  %754 = vmatmul.bf16.vlgmr.msra.gmra.mxu0 %v3036_v20  ;;  %v2088_v20 = vld [vmem:[%s4013_s3 + $0x40] sm:$0xf]  ;;  %v2265_v10 = vor.u32 %v2620_v54, %v2264_v4  ;;  %v2577_v4 = vld [vmem:[%s4013_s3 + $0x54] sm:$0xf]  ;;  %v2098_v54 = vld [vmem:[%s4013_s3 + $0x58] sm:$0xf0] }
  0x64   :  { %1380 = vmatpush.bf16.msrb.mxu0 %v2113_v58  ;;  %767 = vmatmul.bf16.vlgmr.msra.gmra.mxu1 %v3063_v31  ;;  %v2152_v31 = vld [vmem:[%s4013_s3 + $0xc0] sm:$0xf]  ;;  %v2201_v58 = vor.u32 %v2604_v53, %v2200_v52  ;;  %v2416_v52 = vld [vmem:[%s4013_s3 + $0x2d0] sm:$0xf]  ;;  %v2658_v53 = vld [vmem:[%s4013_s3 + $0x2d4] sm:$0xf0] }
  0x65   :  { %1393 = vmatpush.bf16.msrb.mxu1 %v2177_v59  ;;  %780 = vmatmul.bf16.vlgmr.msra.gmra.mxu2 %v3186_v30  ;;  %v2592_v30 = vld [vmem:[%s4013_s3 + $0xc4] sm:$0xf0]  ;;  %v2570_v59 = vld [vmem:[%s4013_s3 + $0x14] sm:$0xf0] }
  0x66   :  { %1406 = vmatpush.bf16.msrb.mxu2 %v2241_v61  ;;  %793 = vmatmul.bf16.vlgmr.msra.gmra.mxu3 %v3188_v33  ;;  %v2089_v33 = vor.u32 %v2576_v24, %v2088_v20  ;;  %v2153_v32 = vor.u32 %v2592_v30, %v2152_v31  ;;  %v2586_v61 = vld [vmem:[%s4013_s3 + $0x94] sm:$0xf0]  ;;  %v2065_v3 = vor.u32 %v2570_v59, %v2064_v57  ;;  %v2597_v24 = vld [vmem:[%s4013_s3 + $0xf4] sm:$0xf]  ;;  %v46_v31 = vld [vmem:[%s4014_s1] sm:$0xff] }
  0x67   :  { %1419 = vmatpush.bf16.msrb.mxu3 %v2305_v1  ;;  %v2618_v1 = vld [vmem:[%s4013_s3 + $0x194] sm:$0xf0]  ;;  %v2129_v5 = vor.u32 %v2586_v61, %v2128_v60  ;;  %v3591_v40 = vpack.c.bf16 %v46_v31, %v46_v31  ;;  %v2181_v41 = vor.u32 %v2597_v24, %v2178_v26  ;;  %v2162_v59 = vld [vmem:[%s4013_s3 + $0xd8] sm:$0xf0]  ;;  %v2417_v60 = vor.u32 %v2658_v53, %v2416_v52  ;;  %v2636_v24 = vld [vmem:[%s4013_s3 + $0x224] sm:$0xf0] }
  0x68   :  { %1381 = vmatpush.bf16.msrb.mxu0 %v2105_v7  ;;  %v2120_v7 = vld [vmem:[%s4013_s3 + $0x80] sm:$0xf]  ;;  %v2257_v14 = vor.u32 %v2618_v1, %v2256_v0  ;;  %v2101_v61 = vor.u32 %v2577_v4, %v2098_v54  ;;  %v2656_v0 = vld [vmem:[%s4013_s3 + $0x2c4] sm:$0xf0]  ;;  %v2575_v1 = vld [vmem:[%s4013_s3 + $0x44] sm:$0xf] }
  0x69   :  { %1394 = vmatpush.bf16.msrb.mxu1 %v2169_v8  ;;  %v2584_v8 = vld [vmem:[%s4013_s3 + $0x84] sm:$0xf0]  ;;  %v2392_v31 = vld [vmem:[%s4013_s3 + $0x2a0] sm:$0xf]  ;;  %v2074_v26 = vld [vmem:[%s4013_s3 + $0x28] sm:$0xf0] }
  0x6a   :  { %1407 = vmatpush.bf16.msrb.mxu2 %v2233_v11  ;;  %v2184_v11 = vld [vmem:[%s4013_s3 + $0x100] sm:$0xf]  ;;  %v2121_v20 = vor.u32 %v2584_v8, %v2120_v7  ;;  %v2154_v7 = vld [vmem:[%s4013_s3 + $0xc8] sm:$0xf0]  ;;  %v2409_v8 = vor.u32 %v2656_v0, %v2408_v63  ;;  %v2648_v53 = vld [vmem:[%s4013_s3 + $0x284] sm:$0xf0] }
  0x6b   :  { %1420 = vmatpush.bf16.msrb.mxu3 %v2297_v15  ;;  %v2646_v15 = vld [vmem:[%s4013_s3 + $0x274] sm:$0xf0]  ;;  %v2185_v30 = vor.u32 %v2600_v12, %v2184_v11  ;;  %v2336_v11 = vld [vmem:[%s4013_s3 + $0x230] sm:$0xf]  ;;  %v2376_v52 = vld [vmem:[%s4013_s3 + $0x280] sm:$0xf] }
  0x6c   :  { %1382 = vmatpush.bf16.msrb.mxu0 %v2097_v21  ;;  %v2248_v21 = vld [vmem:[%s4013_s3 + $0x180] sm:$0xf]  ;;  %v2638_v12 = vld [vmem:[%s4013_s3 + $0x234] sm:$0xf0]  ;;  %v2567_v4 = vld [vmem:[%s4013_s3 + $0x4] sm:$0xf]  ;;  %v2377_v0 = vor.u32 %v2648_v53, %v2376_v52 }
  0x6d   :  { %1395 = vmatpush.bf16.msrb.mxu1 %v2161_v22  ;;  %v2057_v22 = vor.u32 %v2568_v6, %v2056_v2  ;;  %v2090_v2 = vld [vmem:[%s4013_s3 + $0x48] sm:$0xf0]  ;;  %v2591_v6 = vld [vmem:[%s4013_s3 + $0xc4] sm:$0xf]  ;;  %v2637_v53 = vld [vmem:[%s4013_s3 + $0x234] sm:$0xf] }
  0x6e   :  { %1408 = vmatpush.bf16.msrb.mxu2 %v2225_v23  ;;  %v2616_v23 = vld [vmem:[%s4013_s3 + $0x184] sm:$0xf0]  ;;  %v2157_v17 = vor.u32 %v2591_v6, %v2154_v7  ;;  %v2058_v54 = vld [vmem:[%s4013_s3 + $0x8] sm:$0xf0]  ;;  %v50_v63 = vld [vmem:[%s4014_s1 + $0x20] sm:$0xff] }
  0x6f   :  { %1421 = vmatpush.bf16.msrb.mxu3 %v2289_v25  ;;  %v2369_v25 = vor.u32 %v2646_v15, %v2368_v13  ;;  %v2249_v36 = vor.u32 %v2616_v23, %v2248_v21  ;;  %v2400_v13 = vld [vmem:[%s4013_s3 + $0x2b0] sm:$0xf]  ;;  %v2573_v15 = vld [vmem:[%s4013_s3 + $0x34] sm:$0xf]  ;;  %v2146_v21 = vld [vmem:[%s4013_s3 + $0xb8] sm:$0xf0] }
  0x70   :  { %1383 = vmatpush.bf16.msrb.mxu0 %v2089_v33  ;;  %v2117_v33 = vor.u32 %v2581_v18, %v2114_v19  ;;  %v2337_v18 = vor.u32 %v2638_v12, %v2336_v11  ;;  %v2589_v19 = vld [vmem:[%s4013_s3 + $0xb4] sm:$0xf]  ;;  %v2328_v23 = vld [vmem:[%s4013_s3 + $0x220] sm:$0xf]  ;;  %v2643_v11 = vld [vmem:[%s4013_s3 + $0x264] sm:$0xf] }
  0x71   :  { %1396 = vmatpush.bf16.msrb.mxu1 %v2153_v32  ;;  %v2644_v32 = vld [vmem:[%s4013_s3 + $0x264] sm:$0xf0]  ;;  %v2329_v28 = vor.u32 %v2636_v24, %v2328_v23  ;;  %v2282_v52 = vld [vmem:[%s4013_s3 + $0x1c8] sm:$0xf0] }
  0x72   :  { %1409 = vmatpush.bf16.msrb.mxu2 %v2217_v35  ;;  %v48_v35 = vld [vmem:[%s4014_s1 + $0x10] sm:$0xff] }
  0x73   :  { %1422 = vmatpush.bf16.msrb.mxu3 %v2281_v39  ;;  %v2106_v39 = vld [vmem:[%s4013_s3 + $0x68] sm:$0xf0] }
  0x74   :  { %1384 = vmatpush.bf16.msrb.mxu0 %v2081_v44  ;;  %v2361_v44 = vor.u32 %v2644_v32, %v2360_v27  ;;  %v2109_v49 = vor.u32 %v2579_v38, %v2106_v39  ;;  %v2149_v27 = vor.u32 %v2589_v19, %v2146_v21  ;;  %v2650_v38 = vld [vmem:[%s4013_s3 + $0x294] sm:$0xf0]  ;;  %v2569_v39 = vld [vmem:[%s4013_s3 + $0x14] sm:$0xf]  ;;  %v2659_v21 = vld [vmem:[%s4013_s3 + $0x2e4] sm:$0xf] }
  0x75   :  { %1397 = vmatpush.bf16.msrb.mxu1 %v2145_v45  ;;  %v2595_v45 = vld [vmem:[%s4013_s3 + $0xe4] sm:$0xf] }
  0x76   :  { %1410 = vmatpush.bf16.msrb.mxu2 %v2209_v47  ;;  %v3604_v47 = vpack.c.bf16 %v48_v35, %v48_v35  ;;  %v2320_v35 = vld [vmem:[%s4013_s3 + $0x210] sm:$0xf] }
  0x77   :  { %1423 = vmatpush.bf16.msrb.mxu3 %v2273_v51  ;;  %v2642_v51 = vld [vmem:[%s4013_s3 + $0x254] sm:$0xf0] }
  0x78   :  { %1385 = vmatpush.bf16.msrb.mxu0 %v2073_v55  ;;  %v3625_v55 = vpack.c.bf16 %v49_v43, %v49_v43  ;;  %v2353_v57 = vor.u32 %v2642_v51, %v2352_v50  ;;  %v2632_v51 = vld [vmem:[%s4013_s3 + $0x204] sm:$0xf0] }
  0x79   :  { %1398 = vmatpush.bf16.msrb.mxu1 %v2137_v56  ;;  %v2173_v56 = vor.u32 %v2595_v45, %v2170_v46  ;;  %v2585_v45 = vld [vmem:[%s4013_s3 + $0x94] sm:$0xf]  ;;  %v2130_v46 = vld [vmem:[%s4013_s3 + $0x98] sm:$0xf0] }
  0x7a   :  { %1411 = vmatpush.bf16.msrb.mxu2 %v2201_v58  ;;  %v2593_v58 = vld [vmem:[%s4013_s3 + $0xd4] sm:$0xf] }
  0x7b   :  { %1424 = vmatpush.bf16.msrb.mxu3 %v2265_v10  ;;  %v2344_v10 = vld [vmem:[%s4013_s3 + $0x240] sm:$0xf] }
  0x7c   :  { %1386 = vmatpush.bf16.msrb.mxu0 %v2065_v3  ;;  %v2165_v3 = vor.u32 %v2593_v58, %v2162_v59  ;;  %v2370_v58 = vld [vmem:[%s4013_s3 + $0x278] sm:$0xf0]  ;;  %v2613_v59 = vld [vmem:[%s4013_s3 + $0x174] sm:$0xf] }
  0x7d   :  { %1399 = vmatpush.bf16.msrb.mxu1 %v2129_v5  ;;  %v2345_v5 = vor.u32 %v2640_v62, %v2344_v10  ;;  %v2583_v10 = vld [vmem:[%s4013_s3 + $0x84] sm:$0xf]  ;;  %v2122_v62 = vld [vmem:[%s4013_s3 + $0x88] sm:$0xf0] }
  0x7e   :  { %1412 = vmatpush.bf16.msrb.mxu2 %v2193_v9  ;;  %v2093_v9 = vor.u32 %v2575_v1, %v2090_v2  ;;  %v2061_v1 = vor.u32 %v2567_v4, %v2058_v54  ;;  %v51_v2 = vld [vmem:[%s4014_s1 + $0x28] sm:$0xff]  ;;  %v2125_v12 = vor.u32 %v2583_v10, %v2122_v62  ;;  %v2338_v4 = vld [vmem:[%s4013_s3 + $0x238] sm:$0xf0]  ;;  %v2605_v54 = vld [vmem:[%s4013_s3 + $0x134] sm:$0xf] }
  0x7f   :  { %1425 = vmatpush.bf16.msrb.mxu3 %v2257_v14  ;;  %v2654_v14 = vld [vmem:[%s4013_s3 + $0x2b4] sm:$0xf0]  ;;  %v2341_v10 = vor.u32 %v2637_v53, %v2338_v4 }
  0x80   :  { %1387 = vmatpush.bf16.msrb.mxu0 %v2057_v22  ;;  %v2401_v22 = vor.u32 %v2654_v14, %v2400_v13  ;;  %v3789_v13 = vpack.c.bf16 %v50_v63, %v50_v63  ;;  %v2362_v14 = vld [vmem:[%s4013_s3 + $0x268] sm:$0xf0]  ;;  %v2621_v63 = vld [vmem:[%s4013_s3 + $0x1b4] sm:$0xf] }
  0x81   :  { %1400 = vmatpush.bf16.msrb.mxu1 %v2121_v20  ;;  %v2085_v20 = vor.u32 %v2573_v15, %v2082_v16  ;;  %v2611_v15 = vld [vmem:[%s4013_s3 + $0x164] sm:$0xf]  ;;  %v2234_v16 = vld [vmem:[%s4013_s3 + $0x168] sm:$0xf0]  ;;  %v2365_v23 = vor.u32 %v2643_v11, %v2362_v14 }
  0x82   :  { %1413 = vmatpush.bf16.msrb.mxu2 %v2185_v30  ;;  %v2652_v30 = vld [vmem:[%s4013_s3 + $0x2a4] sm:$0xf0]  ;;  %v2237_v24 = vor.u32 %v2611_v15, %v2234_v16  ;;  %v2394_v14 = vld [vmem:[%s4013_s3 + $0x2a8] sm:$0xf0] }
  0x83   :  { %1426 = vmatpush.bf16.msrb.mxu3 %v2249_v36  ;;  %1388 = vmatmul.bf16.vlgmr.msrb.gmra.mxu0 %v3591_v40  ;;  %v2393_v32 = vor.u32 %v2652_v30, %v2392_v31  ;;  %v2634_v36 = vld [vmem:[%s4013_s3 + $0x214] sm:$0xf0]  ;;  %v2298_v31 = vld [vmem:[%s4013_s3 + $0x1e8] sm:$0xf0]  ;;  %v2641_v30 = vld [vmem:[%s4013_s3 + $0x254] sm:$0xf] }
  0x84   :  { %1432 = vmatpush.bf16.msra.mxu0 %v2369_v25  ;;  %1401 = vmatmul.bf16.vlgmr.msrb.gmra.mxu1 %v3593_v42  ;;  %v2571_v25 = vld [vmem:[%s4013_s3 + $0x24] sm:$0xf] }
  0x85   :  { %1445 = vmatpush.bf16.msra.mxu1 %v2433_v29  ;;  %1414 = vmatmul.bf16.vlgmr.msrb.gmra.mxu2 %v3604_v47  ;;  %v2587_v29 = vld [vmem:[%s4013_s3 + $0xa4] sm:$0xf]  ;;  %v2077_v34 = vor.u32 %v2571_v25, %v2074_v26  ;;  %v2354_v25 = vld [vmem:[%s4013_s3 + $0x258] sm:$0xf0]  ;;  %v2609_v26 = vld [vmem:[%s4013_s3 + $0x154] sm:$0xf] }
  0x86   :  { %1458 = vmatpush.bf16.msra.mxu2 %v2117_v33  ;;  %1427 = vmatmul.bf16.vlgmr.msrb.gmra.mxu3 %v3625_v55  ;;  %v2138_v33 = vld [vmem:[%s4013_s3 + $0xa8] sm:$0xf0] }
  0x87   :  { %1471 = vmatpush.bf16.msra.mxu3 %v2181_v41  ;;  %v2066_v41 = vld [vmem:[%s4013_s3 + $0x18] sm:$0xf0]  ;;  %v2141_v43 = vor.u32 %v2587_v29, %v2138_v33  ;;  %v2657_v33 = vld [vmem:[%s4013_s3 + $0x2d4] sm:$0xf] }
  0x88   :  { %1433 = vmatpush.bf16.msra.mxu0 %v2361_v44  ;;  %v2321_v44 = vor.u32 %v2634_v36, %v2320_v35  ;;  %v2069_v50 = vor.u32 %v2569_v39, %v2066_v41  ;;  %v2357_v35 = vor.u32 %v2641_v30, %v2354_v25  ;;  %v2346_v39 = vld [vmem:[%s4013_s3 + $0x248] sm:$0xf0]  ;;  %v2607_v41 = vld [vmem:[%s4013_s3 + $0x144] sm:$0xf]  ;;  %v2649_v25 = vld [vmem:[%s4013_s3 + $0x294] sm:$0xf] }
  0x89   :  { %1446 = vmatpush.bf16.msra.mxu1 %v2425_v48  ;;  %v2312_v48 = vld [vmem:[%s4013_s3 + $0x200] sm:$0xf] }
  0x8a   :  { %1459 = vmatpush.bf16.msra.mxu2 %v2109_v49  ;;  %v2385_v49 = vor.u32 %v2650_v38, %v2384_v37  ;;  %v2625_v37 = vld [vmem:[%s4013_s3 + $0x1d4] sm:$0xf]  ;;  %v2290_v38 = vld [vmem:[%s4013_s3 + $0x1d8] sm:$0xf0] }
  0x8b   :  { %1472 = vmatpush.bf16.msra.mxu3 %v2173_v56  ;;  %v2645_v56 = vld [vmem:[%s4013_s3 + $0x274] sm:$0xf] }
  0x8c   :  { %1434 = vmatpush.bf16.msra.mxu0 %v2353_v57  ;;  %v2133_v57 = vor.u32 %v2585_v45, %v2130_v46  ;;  %v2373_v6 = vor.u32 %v2645_v56, %v2370_v58  ;;  %v2293_v46 = vor.u32 %v2625_v37, %v2290_v38  ;;  %v2210_v56 = vld [vmem:[%s4013_s3 + $0x138] sm:$0xf0]  ;;  %v2186_v37 = vld [vmem:[%s4013_s3 + $0x108] sm:$0xf0] }
  0x8d   :  { %1447 = vmatpush.bf16.msra.mxu1 %v2417_v60  ;;  %v2242_v60 = vld [vmem:[%s4013_s3 + $0x178] sm:$0xf0]  ;;  %v2213_v62 = vor.u32 %v2605_v54, %v2210_v56 }
  0x8e   :  { %1460 = vmatpush.bf16.msra.mxu2 %v2101_v61  ;;  %v2313_v61 = vor.u32 %v2632_v51, %v2312_v48  ;;  %v2245_v7 = vor.u32 %v2613_v59, %v2242_v60  ;;  %v2655_v48 = vld [vmem:[%s4013_s3 + $0x2c4] sm:$0xf]  ;;  %v2653_v60 = vld [vmem:[%s4013_s3 + $0x2b4] sm:$0xf] }
  0x8f   :  { %1473 = vmatpush.bf16.msra.mxu3 %v2165_v3  ;;  %v2661_v3 = vld [vmem:[%s4013_s3 + $0x2f4] sm:$0xf] }
  0x90   :  { %1435 = vmatpush.bf16.msra.mxu0 %v2345_v5  ;;  %v2434_v5 = vld [vmem:[%s4013_s3 + $0x2f8] sm:$0xf0] }
  0x91   :  { %1448 = vmatpush.bf16.msra.mxu1 %v2409_v8  ;;  %v2629_v8 = vld [vmem:[%s4013_s3 + $0x1f4] sm:$0xf] }
  0x92   :  { %1461 = vmatpush.bf16.msra.mxu2 %v2093_v9  ;;  %v2306_v9 = vld [vmem:[%s4013_s3 + $0x1f8] sm:$0xf0] }
  0x93   :  { %1474 = vmatpush.bf16.msra.mxu3 %v2157_v17  ;;  %v3800_v17 = vpack.c.bf16 %v51_v2, %v51_v2  ;;  %v2309_v19 = vor.u32 %v2629_v8, %v2306_v9  ;;  %v2330_v2 = vld [vmem:[%s4013_s3 + $0x228] sm:$0xf0] }
  0x94   :  { %1436 = vmatpush.bf16.msra.mxu0 %v2337_v18  ;;  %v2437_v18 = vor.u32 %v2661_v3, %v2434_v5  ;;  %v2603_v3 = vld [vmem:[%s4013_s3 + $0x124] sm:$0xf]  ;;  %v2202_v5 = vld [vmem:[%s4013_s3 + $0x128] sm:$0xf0] }
  0x95   :  { %1449 = vmatpush.bf16.msra.mxu1 %v2401_v22  ;;  %v2426_v22 = vld [vmem:[%s4013_s3 + $0x2e8] sm:$0xf0]  ;;  %v2205_v16 = vor.u32 %v2603_v3, %v2202_v5 }
  0x96   :  { %1462 = vmatpush.bf16.msra.mxu2 %v2085_v20  ;;  %v2627_v20 = vld [vmem:[%s4013_s3 + $0x1e4] sm:$0xf] }
  0x97   :  { %1475 = vmatpush.bf16.msra.mxu3 %v2149_v27  ;;  %v2226_v27 = vld [vmem:[%s4013_s3 + $0x158] sm:$0xf0]  ;;  %v2301_v29 = vor.u32 %v2627_v20, %v2298_v31 }
  0x98   :  { %1437 = vmatpush.bf16.msra.mxu0 %v2329_v28  ;;  %v2429_v28 = vor.u32 %v2659_v21, %v2426_v22  ;;  %v2229_v36 = vor.u32 %v2609_v26, %v2226_v27  ;;  %v2633_v21 = vld [vmem:[%s4013_s3 + $0x214] sm:$0xf]  ;;  %v2322_v20 = vld [vmem:[%s4013_s3 + $0x218] sm:$0xf0] }
  0x99   :  { %1450 = vmatpush.bf16.msra.mxu1 %v2393_v32  ;;  %v2418_v32 = vld [vmem:[%s4013_s3 + $0x2d8] sm:$0xf0]  ;;  %v2325_v27 = vor.u32 %v2633_v21, %v2322_v20 }
  0x9a   :  { %1463 = vmatpush.bf16.msra.mxu2 %v2077_v34  ;;  %v3838_v34 = vld [vmem:[%s4016_s4] sm:$0xf]  ;;  %v2386_v26 = vld [vmem:[%s4013_s3 + $0x298] sm:$0xf0] }
  0x9b   :  { %1476 = vmatpush.bf16.msra.mxu3 %v2141_v43  ;;  %v2218_v43 = vld [vmem:[%s4013_s3 + $0x148] sm:$0xf0]  ;;  %v156_v45 = vperm.slane %v3838_v34, 0 }
  0x9c   :  { %1438 = vmatpush.bf16.msra.mxu0 %v2321_v44  ;;  %v2421_v44 = vor.u32 %v2657_v33, %v2418_v32  ;;  %v2221_v51 = vor.u32 %v2607_v41, %v2218_v43  ;;  %v2258_v33 = vld [vmem:[%s4013_s3 + $0x198] sm:$0xf0]  ;;  %v2631_v32 = vld [vmem:[%s4013_s3 + $0x204] sm:$0xf] }
  0x9d   :  { %1451 = vmatpush.bf16.msra.mxu1 %v2385_v49  ;;  %v2410_v49 = vld [vmem:[%s4013_s3 + $0x2c8] sm:$0xf0]  ;;  %v160_v58 = vperm.slane %v156_v45, 0  ;;  %v2647_v43 = vld [vmem:[%s4013_s3 + $0x284] sm:$0xf] }
  0x9e   :  { %1464 = vmatpush.bf16.msra.mxu2 %v2069_v50 }
  0x9f   :  { %1477 = vmatpush.bf16.msra.mxu3 %v2133_v57  ;;  %v2413_v57 = vor.u32 %v2655_v48, %v2410_v49  ;;  %v2615_v49 = vld [vmem:[%s4013_s3 + $0x184] sm:$0xf] }
  0xa0   :  { %1439 = vmatpush.bf16.msra.mxu0 %v2313_v61  ;;  %v2402_v61 = vld [vmem:[%s4013_s3 + $0x2b8] sm:$0xf0] }
  0xa1   :  { %1452 = vmatpush.bf16.msra.mxu1 %v2377_v0  ;;  %v2274_v0 = vld [vmem:[%s4013_s3 + $0x1b8] sm:$0xf0]  ;;  %v664_v9 = vpop.f32.mrf.mxu1 }
  0xa2   :  { %1465 = vmatpush.bf16.msra.mxu2 %v2061_v1  ;;  %v2635_v1 = vld [vmem:[%s4013_s3 + $0x224] sm:$0xf]  ;;  %v2277_v11 = vor.u32 %v2621_v63, %v2274_v0 }
  0xa3   :  { %1478 = vmatpush.bf16.msra.mxu3 %v2125_v12  ;;  %1440 = vmatmul.bf16.vlgmr.msra.gmra.mxu0 %v3789_v13  ;;  %v2651_v12 = vld [vmem:[%s4013_s3 + $0x2a4] sm:$0xf]  ;;  %v2333_v15 = vor.u32 %v2635_v1, %v2330_v2 }
  0xa4   :  { %1484 = vmatpush.bf16.msrb.mxu0 %v2245_v7  ;;  %1453 = vmatmul.bf16.vlgmr.msra.gmra.mxu1 %v3800_v17  ;;  %v2405_v7 = vor.u32 %v2653_v60, %v2402_v61  ;;  %v2397_v31 = vor.u32 %v2651_v12, %v2394_v14  ;;  %v157_v60 = vperm.slane %v3838_v34, 2 }
  0xa5   :  { %1497 = vmatpush.bf16.msrb.mxu1 %v2309_v19  ;;  %1466 = vmatmul.bf16.vlgmr.msra.gmra.mxu2 %v3591_v40  ;;  %v2639_v40 = vld [vmem:[%s4013_s3 + $0x244] sm:$0xf]  ;;  %v2266_v19 = vld [vmem:[%s4013_s3 + $0x1a8] sm:$0xf0] }
  0xa6   :  { %1510 = vmatpush.bf16.msrb.mxu2 %v2373_v6  ;;  %1479 = vmatmul.bf16.vlgmr.msra.gmra.mxu3 %v3593_v42  ;;  %v2349_v50 = vor.u32 %v2639_v40, %v2346_v39  ;;  %v2623_v42 = vld [vmem:[%s4013_s3 + $0x1c4] sm:$0xf]  ;;  %v651_v6 = vpop.f32.mrf.mxu0  ;;  %v2389_v40 = vor.u32 %v2649_v25, %v2386_v26 }
  0xa7   :  { %1523 = vmatpush.bf16.msrb.mxu3 %v2437_v18  ;;  %v2285_v59 = vor.u32 %v2623_v42, %v2282_v52  ;;  %v652_v8 = vadd.f32 %v651_v6, %v160_v58  ;;  %v2619_v18 = vld [vmem:[%s4013_s3 + $0x1a4] sm:$0xf] }
  0xa8   :  { %1485 = vmatpush.bf16.msrb.mxu0 %v2237_v24  ;;  %v2194_v24 = vld [vmem:[%s4013_s3 + $0x118] sm:$0xf0]  ;;  %v2269_v30 = vor.u32 %v2619_v18, %v2266_v19  ;;  %v677_v45 = vpop.f32.mrf.mxu2  ;;  %v2667_v19 = vld [vmem:[%s4018_s5 + $0x20] sm:$0xff] }
  0xa9   :  { %1498 = vmatpush.bf16.msrb.mxu1 %v2301_v29  ;;  %v665_v22 = vadd.f32 %v664_v9, %v652_v8  ;;  %v2617_v29 = vld [vmem:[%s4013_s3 + $0x194] sm:$0xf]  ;;  %v666_v39 = vpop.f32.mrf.mxu1  ;;  %v2663_v26 = vld [vmem:[%s4018_s5] sm:$0xff] }
  0xaa   :  { %1511 = vmatpush.bf16.msrb.mxu2 %v2365_v23  ;;  %v2601_v23 = vld [vmem:[%s4013_s3 + $0x114] sm:$0xf]  ;;  %v2261_v41 = vor.u32 %v2617_v29, %v2258_v33 }
  0xab   :  { %1524 = vmatpush.bf16.msrb.mxu3 %v2429_v28  ;;  %v2197_v28 = vor.u32 %v2601_v23, %v2194_v24  ;;  %v690_v52 = vpop.f32.mrf.mxu3  ;;  %v2669_v8 = vld [vmem:[%s4018_s5 + $0x30] sm:$0xff]  ;;  %v2672_v24 = vld [vmem:[%s4015_s7] ss:$0 sm:$0xff] }
  0xac   :  { %1486 = vmatpush.bf16.msrb.mxu0 %v2229_v36  ;;  %v2599_v36 = vld [vmem:[%s4013_s3 + $0x104] sm:$0xf]  ;;  %v2665_v23 = vld [vmem:[%s4018_s5 + $0x10] sm:$0xff]  ;;  %1631 = vrot.lane.b32.xlu0 %v2672_v24, %s2679_s12 }
  0xad   :  { %1499 = vmatpush.bf16.msrb.mxu1 %v2293_v46  ;;  %v2189_v48 = vor.u32 %v2599_v36, %v2186_v37 }
  0xae   :  { %1512 = vmatpush.bf16.msrb.mxu2 %v2357_v35  ;;  %v2314_v35 = vld [vmem:[%s4013_s3 + $0x208] sm:$0xf0]  ;;  %v653_v38 = vpop.f32.mrf.mxu0 }
  0xaf   :  { %1525 = vmatpush.bf16.msrb.mxu3 %v2421_v44  ;;  %v2378_v44 = vld [vmem:[%s4013_s3 + $0x288] sm:$0xf0]  ;;  %v2317_v46 = vor.u32 %v2631_v32, %v2314_v35 }
  0xb0   :  { %1487 = vmatpush.bf16.msrb.mxu0 %v2221_v51  ;;  %v678_v51 = vadd.f32 %v677_v45, %v665_v22  ;;  %v2381_v42 = vor.u32 %v2647_v43, %v2378_v44  ;;  %v679_v54 = vpop.f32.mrf.mxu2  ;;  %v2666_v22 = vld [vmem:[%s4018_s5 + $0x18] sm:$0xff] }
  0xb1   :  { %1500 = vmatpush.bf16.msrb.mxu1 %v2285_v59 }
  0xb2   :  { %1513 = vmatpush.bf16.msrb.mxu2 %v2349_v50  ;;  %v2250_v50 = vld [vmem:[%s4013_s3 + $0x188] sm:$0xf0]  ;;  %v691_v4 = vadd.f32 %v690_v52, %v678_v51 }
  0xb3   :  { %1526 = vmatpush.bf16.msrb.mxu3 %v2413_v57  ;;  %v2253_v53 = vor.u32 %v2615_v49, %v2250_v50  ;;  %v692_v56 = vpop.f32.mrf.mxu3 }
  0xb4   :  { %1488 = vmatpush.bf16.msrb.mxu0 %v2213_v62 }
  0xb5   :  { %1501 = vmatpush.bf16.msrb.mxu1 %v2277_v11  ;;  %v2668_v11 = vld [vmem:[%s4018_s5 + $0x28] sm:$0xff] }
  0xb6   :  { %1514 = vmatpush.bf16.msrb.mxu2 %v2341_v10  ;;  %v161_v10 = vperm.slane %v157_v60, 0 }
  0xb7   :  { %1527 = vmatpush.bf16.msrb.mxu3 %v2405_v7 }
  0xb8   :  { %1489 = vmatpush.bf16.msrb.mxu0 %v2205_v16 }
  0xb9   :  { %1502 = vmatpush.bf16.msrb.mxu1 %v2269_v30  ;;  %v2664_v30 = vld [vmem:[%s4018_s5 + $0x8] sm:$0xff] }
  0xba   :  { %1515 = vmatpush.bf16.msrb.mxu2 %v2333_v15 }
  0xbb   :  { %1528 = vmatpush.bf16.msrb.mxu3 %v2397_v31 }
  0xbc   :  { %1490 = vmatpush.bf16.msrb.mxu0 %v2197_v28 }
  0xbd   :  { %1503 = vmatpush.bf16.msrb.mxu1 %v2261_v41 }
  0xbe   :  { %1516 = vmatpush.bf16.msrb.mxu2 %v2325_v27  ;;  %v894_v27 = vperm.slane %v3838_v34, 1 }
  0xbf   :  { %1529 = vmatpush.bf16.msrb.mxu3 %v2389_v40 }
  0xc0   :  { %1491 = vmatpush.bf16.msrb.mxu0 %v2189_v48  ;;  %v703_v57 = vpop.f32.mrf.mxu0  ;;  %v898_v35 = vperm.slane %v894_v27, 1 }
  0xc1   :  { %1504 = vmatpush.bf16.msrb.mxu1 %v2253_v53  ;;  %v704_v58 = vadd.f32 %v703_v57, %v691_v4  ;;  %v716_v59 = vpop.f32.mrf.mxu1  ;;  %v895_v4 = vperm.slane %v3838_v34, 3 }
  0xc2   :  { %1517 = vmatpush.bf16.msrb.mxu2 %v2317_v46 }
  0xc3   :  { %1530 = vmatpush.bf16.msrb.mxu3 %v2381_v42  ;;  %1492 = vmatmul.bf16.vlgmr.msrb.gmra.mxu0 %v3604_v47  ;;  %v717_v61 = vadd.f32 %v716_v59, %v704_v58  ;;  %v899_v57 = vperm.slane %v895_v4, 1 }
  0xc4   :  { %1505 = vmatmul.bf16.vlgmr.msrb.gmra.mxu1 %v3625_v55  ;;  %v2670_v55 = vld [vmem:[%s4018_s5 + $0x38] sm:$0xff] }
  0xc5   :  { %1518 = vmatmul.bf16.vlgmr.msrb.gmra.mxu2 %v3789_v13  ;;  %1608 = vmatpush.bf16.msra.mxu0 %v2670_v55 }
  0xc6   :  { %1531 = vmatmul.bf16.vlgmr.msrb.gmra.mxu3 %v3800_v17 }
  0xc8   :  { %v705_v62 = vpop.f32.mrf.mxu0  ;;  %v729_v63 = vpop.f32.mrf.mxu2 }
  0xc9   :  { %v718_v0 = vpop.f32.mrf.mxu1  ;;  %v730_v13 = vadd.f32 %v729_v63, %v161_v10  ;;  %v742_v1 = vpop.f32.mrf.mxu3  ;;  %1609 = vmatpush.bf16.msra.mxu0 %v2669_v8 }
  0xcb   :  { %v743_v2 = vadd.f32 %v742_v1, %v730_v13 }
  0xcd   :  { %1610 = vmatpush.bf16.msra.mxu0 %v2668_v11 }
  0xd0   :  { %v731_v3 = vpop.f32.mrf.mxu2 }
  0xd1   :  { %v744_v47 = vpop.f32.mrf.mxu3  ;;  %1611 = vmatpush.bf16.msra.mxu0 %v2667_v19 }
  0xd5   :  { %1612 = vmatpush.bf16.msra.mxu0 %v2666_v22 }
  0xd9   :  { %1613 = vmatpush.bf16.msra.mxu0 %v2665_v23 }
  0xdd   :  { %1614 = vmatpush.bf16.msra.mxu0 %v2664_v30 }
  0xe0   :  { %v755_v5 = vpop.f32.mrf.mxu0 }
  0xe1   :  { %v756_v17 = vadd.f32 %v755_v5, %v743_v2  ;;  %v768_v6 = vpop.f32.mrf.mxu1  ;;  %1615 = vmatpush.bf16.msra.mxu0 %v2663_v26 }
  0xe3   :  { %v769_v7 = vadd.f32 %v768_v6, %v756_v17  ;;  %v14_v6 = vstv %s4019_s8 }
  0xe4   :  { %15 = vst [vmem:[#allocation2] sm:$0x1] %v14_v6 }
  0xe8   :  { %v781_v9 = vpop.f32.mrf.mxu2  ;;  %v757_v12 = vpop.f32.mrf.mxu0 }
  0xe9   :  { %v782_v14 = vadd.f32 %v781_v9, %v769_v7  ;;  %v770_v15 = vpop.f32.mrf.mxu1  ;;  %v794_v16 = vpop.f32.mrf.mxu3  ;;  %v2673_v7 = vld [vmem:[%s4017_s6] ss:$0 sm:$0xff] }
  0xeb   :  { %v795_v18 = vadd.f32 %v794_v16, %v782_v14 }
  0xf0   :  { %v783_v21 = vpop.f32.mrf.mxu2 }
  0xf1   :  { %v796_v20 = vpop.f32.mrf.mxu3 }
 0x100   :  { %v1389_v31 = vpop.f32.mrf.mxu0 }
 0x101   :  { %v1402_v25 = vpop.f32.mrf.mxu1  ;;  %v1390_v36 = vadd.f32 %v1389_v31, %v898_v35 }
 0x103   :  { %v1403_v40 = vadd.f32 %v1402_v25, %v1390_v36 }
 0x108   :  { %v1391_v28 = vpop.f32.mrf.mxu0  ;;  %v1415_v29 = vpop.f32.mrf.mxu2 }
 0x109   :  { %v1404_v33 = vpop.f32.mrf.mxu1  ;;  %v1428_v32 = vpop.f32.mrf.mxu3  ;;  %v1416_v39 = vadd.f32 %v1415_v29, %v1403_v40 }
 0x10b   :  { %v1429_v41 = vadd.f32 %v1428_v32, %v1416_v39 }
 0x110   :  { %v1417_v37 = vpop.f32.mrf.mxu2 }
 0x111   :  { %v1430_v38 = vpop.f32.mrf.mxu3 }
 0x11e   :  { %v1632_v11 = vpop.permute.xlu0 %1631 }
 0x120   :  { %v1441_v43 = vpop.f32.mrf.mxu0 }
 0x121   :  { %v1442_v44 = vadd.f32 %v1441_v43, %v1429_v41  ;;  %v1454_v45 = vpop.f32.mrf.mxu1 }
 0x123   :  { %v1455_v46 = vadd.f32 %v1454_v45, %v1442_v44 }
 0x125   :  { %v1537_v48 = vadd.f32 %v1455_v46, %v717_v61 }
 0x127   :  { %v1538_v49 = vmax.f32 %v1537_v48, 0.0 }
 0x128   :  { %v1443_v50 = vpop.f32.mrf.mxu0  ;;  %v1467_v51 = vpop.f32.mrf.mxu2 }
 0x129   :  { %v1556_v42 = vpack.c.bf16 %v1538_v49, %v1538_v49  ;;  %v1456_v52 = vpop.f32.mrf.mxu1  ;;  %v1480_v53 = vpop.f32.mrf.mxu3  ;;  %v1468_v58 = vadd.f32 %v1467_v51, %v899_v57 }
 0x12b   :  { %1616 = vmatmul.bf16.vlgmr.msra.gmra.mxu0 %v1556_v42  ;;  %v1481_v59 = vadd.f32 %v1480_v53, %v1468_v58 }
 0x130   :  { %v1469_v54 = vpop.f32.mrf.mxu2 }
 0x131   :  { %v1482_v56 = vpop.f32.mrf.mxu3 }
 0x140   :  { %v1493_v60 = vpop.f32.mrf.mxu0 }
 0x141   :  { %v1494_v10 = vadd.f32 %v1493_v60, %v1481_v59  ;;  %v1506_v62 = vpop.f32.mrf.mxu1 }
 0x143   :  { %v1507_v63 = vadd.f32 %v1506_v62, %v1494_v10 }
 0x148   :  { %v1519_v0 = vpop.f32.mrf.mxu2  ;;  %v1495_v2 = vpop.f32.mrf.mxu0 }
 0x149   :  { %v1520_v61 = vadd.f32 %v1519_v0, %v1507_v63  ;;  %v1532_v13 = vpop.f32.mrf.mxu3  ;;  %v1508_v47 = vpop.f32.mrf.mxu1 }
 0x14b   :  { %v1533_v1 = vadd.f32 %v1532_v13, %v1520_v61 }
 0x14d   :  { %v1536_v3 = vmul.f32 %v1533_v1, %v795_v18  ;;  %v2674_v18 = vld [vmem:[#allocation2] ss:$0 sm:$0xff] }
 0x14f   :  { %v1626_v5 = vmul.f32 %v2672_v24, %v1536_v3 }
 0x150   :  { %v1521_v55 = vpop.f32.mrf.mxu2 }
 0x151   :  { %v1628_v34 = vsel %vm1627_vm0, %v1626_v5, 0.0  ;;  %v1534_v17 = vpop.f32.mrf.mxu3 }
 0x152   :  { %1629 = vadd.xlane.f32.xlu0 %v1628_v34 }
 0x1a8   :  { %v1617_v8 = vpop.f32.mrf.mxu0 }
 0x1a9   :  { %v1618_v9 = vadd.f32 %v2673_v7, %v1617_v8 }
 0x1ab   :  { %v1621_v12 = vmax.f32 %v1618_v9, 0.0 }
 0x1ad   :  { %v1634_v14 = vmul.f32 %v1632_v11, %v1621_v12 }
 0x1af   :  { %v1636_v15 = vsel %vm1635_vm1, %v1634_v14, 0.0 }
 0x1b0   :  { %v1619_v16 = vpop.f32.mrf.mxu0  ;;  %1637 = vadd.xlane.f32.xlu1 %v1636_v15 }
 0x1c5   :  { %v1630_v19 = vpop.xlane.xlu0 %1629 }
 0x223   :  { %v1638_v21 = vpop.xlane.xlu1 %1637 }
 0x224   :  { %v1639_v22 = vadd.f32 %v1638_v21, %v1630_v19 }
 0x226   :  { %v1644_v20 = vadd.f32 %v2674_v18, %v1639_v22 }
 0x228   :  { %v2470_v23 = vmul.f32 -1.442695, %v1644_v20 }
 0x22a   :  { %2675 = vpow2.f32 %v2470_v23 }
 0x230   :  { %v2676_v24 = vpop.eup %2675 }
 0x231   :  { %v1648_v31 = vadd.f32 1.0, %v2676_v24 }
 0x233   :  { %2677 = vrcp.f32 %v1648_v31  ;;  %v1660_v27 = vand.u32 2147483648, %v1648_v31  ;;  %v1658_v29 = vand.u32 2147483647, %v1648_v31  ;;  %vm1654_vm3 = vweird.f32 %v1648_v31 }
 0x235   :  { %v1661_v32 = vor.u32 1.1754944e-38, %v1660_v27  ;;  %vm1659_vm6 = vcmp.eq.f32.partialorder %v1658_v29, 8.507059e+37 }
 0x239   :  { %v2678_v30 = vpop.eup %2677 }
 0x23a   :  { %v1650_v25 = vmul.f32 %v2678_v30, %v1648_v31  ;;  %vm1655_vm2 = vweird.f32 %v2678_v30 }
 0x23b   :  { %vm1656_vm5 = vmor %vm1654_vm3, %vm1655_vm2 }
 0x23c   :  { %v1651_v26 = vsub.f32 1.0, %v1650_v25 }
 0x23e   :  { %v1652_v28 = vmul.f32 %v2678_v30, %v1651_v26 }
 0x240   :  { %v1653_v33 = vadd.f32 %v2678_v30, %v1652_v28 }
 0x242   :  { %v1657_v35 = vsel %vm1656_vm5, %v2678_v30, %v1653_v33 }
 0x243   :  { %v1662_v36 = vsel %vm1659_vm6, %v1661_v32, %v1657_v35 }
 0x244   :  { %1665 = vst.msk [vmem:[%s4020_s9] sm:$0xff] %vm1664_vm4, %v1662_v36 }

</bundles_post_ra>
